<compile_context>
chip_gen: v5e
topology: v5e:2x2
jax: 0.10.0
libtpu: 0.0.40
codegen_flags: <defaults>
</compile_context>

<pallas_src>
import jax
import jax.numpy as jnp
from jax import lax
from jax.experimental import pallas as pl
from jax.experimental.pallas import tpu as pltpu

# Module configuration: LinearConductive(in_seq_size=16, out_seq_size=8,
# n_channels=4), AmplitudeAwareNonlin(hidden_size=16).
B, C, S_IN, S_OUT, H = 2, 4, 16, 8, 16
BN_EPS = 1e-5


def linear_conductive_kernel(x_ref, p_ref, mlp_ref, o_ref):
    """Tx filter -> amplitude nonlinearity -> Rx filter -> BatchNorm.

    VMEM:
      x_ref : (B, S_in*C*2)          activations, columns ordered (i, c, k)
      p_ref : (K_tx + 3*CS + 4, 2*CS) packed constants (see pack_params)
      o_ref : (B, CS)                 output, columns ordered (c, o)
    SMEM:
      mlp_ref : (3*H + 1,)            [w1 | b1 | w2 | b2] of the 1->H->1 MLP
    """
    n_b, cs = o_ref.shape                        # B, C*S_out
    k_tx = x_ref.shape[1]                        # S_in*C*2
    hidden = (mlp_ref.shape[0] - 1) // 3
    inv_n = 1.0 / n_b                            # static (compile-time) scalar

    off_wrx = k_tx                               # Rx block-diag weight rows
    off_avg = off_wrx + 2 * cs                   # BN channel-averaging matrix
    off_bias = off_avg + cs                      # bias / affine rows

    # ---- Txa filter ensemble: one dense dot vs. block-diagonal W_tx --------
    y = jnp.dot(x_ref[...], p_ref[0:k_tx, :],
                preferred_element_type=jnp.float32,
                precision=lax.Precision.HIGHEST)
    y = y + p_ref[off_bias:off_bias + 1, :]      # (B, 2*CS), columns [I | Q]
    y_i = y[:, :cs]                              # (B, CS)  I component
    y_q = y[:, cs:]                              # (B, CS)  Q component

    # ---- AmplitudeAwareNonlin: Linear(1,H) -> SiLU -> Linear(H,1) ----------
    # Unrolled over H hidden units with scalar params from SMEM; all vector
    # work stays on a single (B, CS) tile (VALU + EUP only).
    amp = y_i * y_i + y_q * y_q
    scale = jnp.zeros_like(amp)
    for k in range(hidden):
        hk = amp * mlp_ref[k] + mlp_ref[hidden + k]
        hk = hk * jax.nn.sigmoid(hk)             # SiLU on the EUP
        scale = scale + hk * mlp_ref[2 * hidden + k]
    scale = scale + mlp_ref[3 * hidden]          # b2

    # ---- Rxa filter ensemble: two dots vs. I/Q halves of block-diag W_rx ---
    z_i = y_i * scale
    z_q = y_q * scale
    r = (jnp.dot(z_i, p_ref[off_wrx:off_wrx + cs, 0:cs],
                 preferred_element_type=jnp.float32,
                 precision=lax.Precision.HIGHEST)
         + jnp.dot(z_q, p_ref[off_wrx + cs:off_wrx + 2 * cs, 0:cs],
                   preferred_element_type=jnp.float32,
                   precision=lax.Precision.HIGHEST)
         + p_ref[off_bias + 1:off_bias + 2, 0:cs])          # (B, CS)

    # ---- BatchNorm1d (training mode: biased batch stats, per channel) ------
    # seg[j', j] = (channel(j') == channel(j)) / S_out ; 1/B applied here.
    seg = p_ref[off_avg:off_avg + cs, 0:cs]                 # (CS, CS)
    mean = jnp.sum(jnp.dot(r, seg, preferred_element_type=jnp.float32,
                           precision=lax.Precision.HIGHEST),
                   axis=0, keepdims=True) * inv_n           # (1, CS)
    d = r - mean
    var = jnp.sum(jnp.dot(d * d, seg, preferred_element_type=jnp.float32,
                          precision=lax.Precision.HIGHEST),
                  axis=0, keepdims=True) * inv_n            # (1, CS)

    gamma = p_ref[off_bias + 2:off_bias + 3, 0:cs]
    beta = p_ref[off_bias + 3:off_bias + 4, 0:cs]
    o_ref[...] = (gamma * d * lax.rsqrt(var + BN_EPS) + beta).astype(o_ref.dtype)


def pack_params(params):
    """Pack all module parameters into one VMEM slab + one SMEM vector.

    Slab layout (rows, all padded to 2*CS columns):
      [0, K_tx)               block-diagonal Tx weight, cols ordered (k, c, o)
      [K_tx, K_tx+2*CS)       block-diagonal Rx weight (rows (k, c, s)), cols 0:CS
      [.., ..+CS)             per-channel averaging matrix / S_out, cols 0:CS
      next 4 rows             b_tx row (2*CS) | b_rx row (CS) | gamma (CS) | beta (CS)
    """
    f32 = jnp.float32
    w_tx = params["W_tx"].astype(f32)                    # (C, S_in, S_out)
    w_rx = params["W_rx"].astype(f32)                    # (C, 2*S_out, S_out)
    n_c, s_in, s_out = w_tx.shape
    cs = n_c * s_out
    k_tx = s_in * n_c * 2
    eye_c = jnp.eye(n_c, dtype=f32)
    eye_k = jnp.eye(2, dtype=f32)

    # Tx: rows (i, c, k) -> cols (k', c', o); nonzero only for c==c', k==k'.
    w_tx_big = jnp.einsum("cio,cd,ke->ickedo", w_tx, eye_c, eye_k)
    w_tx_big = w_tx_big.reshape(k_tx, 2 * cs)

    # Rx: rows (k, c, s) -> cols (c', o); nonzero only for c==c'.
    w_rx_big = jnp.einsum("ckso,cd->kcsdo",
                          w_rx.reshape(n_c, 2, s_out, s_out), eye_c)
    w_rx_big = w_rx_big.reshape(2 * cs, cs)

    # BatchNorm per-channel averaging matrix (1/B is applied in-kernel).
    seg = jnp.kron(eye_c, jnp.ones((s_out, s_out), f32)) / s_out   # (CS, CS)

    b_tx_row = jnp.tile(params["b_tx"].astype(f32)[:, 0, :].reshape(cs), 2)
    b_rx_row = params["b_rx"].astype(f32)[:, 0, :].reshape(cs)
    gamma_row = jnp.repeat(params["gamma"].astype(f32).reshape(n_c), s_out)
    beta_row = jnp.repeat(params["beta"].astype(f32).reshape(n_c), s_out)

    def row(v):
        return jnp.pad(v, (0, 2 * cs - v.shape[0]))[None, :]

    def cols(a):
        return jnp.pad(a, ((0, 0), (0, 2 * cs - a.shape[1])))

    slab = jnp.concatenate(
        [w_tx_big, cols(w_rx_big), cols(seg),
         row(b_tx_row), row(b_rx_row), row(gamma_row), row(beta_row)], axis=0)

    mlp = jnp.concatenate([params["w1"], params["b1"], params["w2"],
                           params["b2"]]).astype(f32)
    return slab, mlp


@jax.jit
def linear_conductive(x, slab, mlp):
    """x: (B, S_in, C, 2) float32  ->  (B, C, S_out) float32."""
    n_b, s_in, n_c, _ = x.shape
    cs = slab.shape[1] // 2
    s_out = cs // n_c

    x_flat = x.reshape(n_b, s_in * n_c * 2)      # free row-major collapse (no transpose)

    vmem = pl.BlockSpec(memory_space=pltpu.MemorySpace.VMEM)
    smem = pl.BlockSpec(memory_space=pltpu.MemorySpace.SMEM)

    out_flat = pl.pallas_call(
        linear_conductive_kernel,
        out_shape=jax.ShapeDtypeStruct((n_b, cs), jnp.float32),
        in_specs=[vmem, vmem, smem],
        out_specs=vmem,
    )(x_flat, slab, mlp)

    return out_flat.reshape(n_b, n_c, s_out)     # free row-major reshape


def reference(x, p):
    """Pure-JAX reference of the same forward pass (for correctness check)."""
    hp = lax.Precision.HIGHEST
    y = jnp.einsum("bick,cio->bock", x, p["W_tx"], precision=hp) \
        + jnp.transpose(p["b_tx"][:, 0, :])[None, :, :, None]      # (B,S_out,C,2)
    amp = y[..., 0] ** 2 + y[..., 1] ** 2                          # (B,S_out,C)
    h = amp[..., None] * p["w1"] + p["b1"]                         # (B,S_out,C,H)
    h = h * jax.nn.sigmoid(h)
    scale = jnp.sum(h * p["w2"], axis=-1) + p["b2"][0]             # (B,S_out,C)
    nl = y * scale[..., None]
    z = jnp.concatenate([nl[..., 0], nl[..., 1]], axis=1)          # (B,2*S_out,C)
    r = jnp.einsum("bjc,cjo->bco", z, p["W_rx"], precision=hp) \
        + p["b_rx"][:, 0][None]                                    # (B,C,S_out)
    mean = r.mean(axis=(0, 2), keepdims=True)
    var = ((r - mean) ** 2).mean(axis=(0, 2), keepdims=True)
    g = p["gamma"].reshape(1, -1, 1)
    b = p["beta"].reshape(1, -1, 1)
    return g * (r - mean) * lax.rsqrt(var + BN_EPS) + b


if __name__ == "__main__":
    key = jax.random.PRNGKey(0)
    ks = jax.random.split(key, 12)

    x = jax.random.normal(ks[0], (B, S_IN, C, 2), jnp.float32)

    params = {
        # Txa filter: per-channel (S_in -> S_out) linear, stored pre-transposed
        "W_tx": jax.random.normal(ks[1], (C, S_IN, S_OUT), jnp.float32) * 0.1,
        "b_tx": jax.random.normal(ks[2], (C, 1, S_OUT), jnp.float32) * 0.1,
        # AmplitudeAwareNonlin MLP: Linear(1,16) -> SiLU -> Linear(16,1).
        # The PyTorch __init__ sets w2 = 0, b2 = 1 (scale == 1); random values
        # are used here so the nonlinearity path is actually exercised.
        "w1": jax.random.normal(ks[3], (H,), jnp.float32) * 0.5,
        "b1": jax.random.normal(ks[4], (H,), jnp.float32) * 0.5,
        "w2": jax.random.normal(ks[5], (H,), jnp.float32) * 0.1,
        "b2": jnp.ones((1,), jnp.float32),
        # Rxa filter: per-channel (2*S_out -> S_out) linear, pre-transposed
        "W_rx": jax.random.normal(ks[6], (C, 2 * S_OUT, S_OUT), jnp.float32) * 0.1,
        "b_rx": jax.random.normal(ks[7], (C, 1, S_OUT), jnp.float32) * 0.1,
        # BatchNorm1d affine params (randomized to exercise the affine path;
        # module defaults are gamma=1, beta=0)
        "gamma": 1.0 + 0.1 * jax.random.normal(ks[8], (C, 1), jnp.float32),
        "beta": 0.1 * jax.random.normal(ks[9], (C, 1), jnp.float32),
    }

    slab, mlp = pack_params(params)          # one-time parameter packing
    out = jax.block_until_ready(linear_conductive(x, slab, mlp))
    ref = jax.block_until_ready(reference(x, params))

    assert out.shape == (B, C, S_OUT), out.shape
    assert jnp.allclose(out, ref, atol=1e-4, rtol=1e-4), (
        float(jnp.max(jnp.abs(out - ref))))
    print("KERNEL_OK")
</pallas_src>

<mosaic_0001>
module attributes {stable_mosaic.version = 11 : i64} {
  func.func @linear_conductive_kernel(%arg0: memref<2x128xf32, #tpu.memory_space<vmem>>, %arg1: memref<228x64xf32, #tpu.memory_space<vmem>>, %arg2: memref<49xf32, #tpu.memory_space<smem>>, %arg3: memref<2x32xf32, #tpu.memory_space<vmem>>) attributes {dimension_semantics = [], scalar_prefetch = 0 : i64, scratch_operands = 0 : i64, tpu.core_type = #tpu.core_type<tc>} {
    %c0 = arith.constant 0 : index
    %c0_0 = arith.constant 0 : index
    %0 = vector.load %arg0[%c0, %c0_0] : memref<2x128xf32, #tpu.memory_space<vmem>>, vector<2x128xf32>
    %c0_1 = arith.constant 0 : index
    %c0_2 = arith.constant 0 : index
    %1 = vector.load %arg1[%c0_1, %c0_2] : memref<228x64xf32, #tpu.memory_space<vmem>>, vector<128x64xf32>
    %cst = arith.constant dense<0.000000e+00> : vector<2x64xf32>
    %2 = tpu.matmul %0, %1, %cst {dimension_numbers = #tpu.dot_dimension_numbers<[1], [0], [0], [1], [0, 0, 1, 1], [], []>, precision = #tpu.contract_precision<fp32>} : vector<2x128xf32>, vector<128x64xf32>, vector<2x64xf32> -> vector<2x64xf32>
    %c224 = arith.constant 224 : index
    %c0_3 = arith.constant 0 : index
    %3 = vector.load %arg1[%c224, %c0_3] : memref<228x64xf32, #tpu.memory_space<vmem>>, vector<1x64xf32>
    %4 = vector.broadcast %3 : vector<1x64xf32> to vector<2x64xf32>
    %5 = arith.addf %2, %4 : vector<2x64xf32>
    %6 = vector.extract_strided_slice %5 {offsets = [0, 0], sizes = [2, 32], strides = [1, 1]} : vector<2x64xf32> to vector<2x32xf32>
    %7 = vector.extract_strided_slice %5 {offsets = [0, 32], sizes = [2, 32], strides = [1, 1]} : vector<2x64xf32> to vector<2x32xf32>
    %8 = arith.mulf %6, %6 : vector<2x32xf32>
    %9 = arith.mulf %7, %7 : vector<2x32xf32>
    %10 = arith.addf %8, %9 : vector<2x32xf32>
    %cst_4 = arith.constant 0.000000e+00 : f32
    %11 = vector.broadcast %cst_4 : f32 to vector<2x32xf32>
    %c0_5 = arith.constant 0 : index
    %12 = memref.load %arg2[%c0_5] : memref<49xf32, #tpu.memory_space<smem>>
    %13 = vector.broadcast %12 : f32 to vector<2x32xf32>
    %14 = arith.mulf %10, %13 : vector<2x32xf32>
    %c16 = arith.constant 16 : index
    %15 = memref.load %arg2[%c16] : memref<49xf32, #tpu.memory_space<smem>>
    %16 = vector.broadcast %15 : f32 to vector<2x32xf32>
    %17 = arith.addf %14, %16 : vector<2x32xf32>
    %18 = arith.negf %17 : vector<2x32xf32>
    %19 = math.exp %18 : vector<2x32xf32>
    %cst_6 = arith.constant 1.000000e+00 : f32
    %20 = vector.broadcast %cst_6 : f32 to vector<2x32xf32>
    %21 = arith.addf %20, %19 : vector<2x32xf32>
    %22 = arith.divf %20, %21 : vector<2x32xf32>
    %23 = arith.mulf %17, %22 : vector<2x32xf32>
    %c32 = arith.constant 32 : index
    %24 = memref.load %arg2[%c32] : memref<49xf32, #tpu.memory_space<smem>>
    %25 = vector.broadcast %24 : f32 to vector<2x32xf32>
    %26 = arith.mulf %23, %25 : vector<2x32xf32>
    %27 = arith.addf %11, %26 : vector<2x32xf32>
    %c1 = arith.constant 1 : index
    %28 = memref.load %arg2[%c1] : memref<49xf32, #tpu.memory_space<smem>>
    %29 = vector.broadcast %28 : f32 to vector<2x32xf32>
    %30 = arith.mulf %10, %29 : vector<2x32xf32>
    %c17 = arith.constant 17 : index
    %31 = memref.load %arg2[%c17] : memref<49xf32, #tpu.memory_space<smem>>
    %32 = vector.broadcast %31 : f32 to vector<2x32xf32>
    %33 = arith.addf %30, %32 : vector<2x32xf32>
    %34 = arith.negf %33 : vector<2x32xf32>
    %35 = math.exp %34 : vector<2x32xf32>
    %cst_7 = arith.constant 1.000000e+00 : f32
    %36 = vector.broadcast %cst_7 : f32 to vector<2x32xf32>
    %37 = arith.addf %36, %35 : vector<2x32xf32>
    %38 = arith.divf %36, %37 : vector<2x32xf32>
    %39 = arith.mulf %33, %38 : vector<2x32xf32>
    %c33 = arith.constant 33 : index
    %40 = memref.load %arg2[%c33] : memref<49xf32, #tpu.memory_space<smem>>
    %41 = vector.broadcast %40 : f32 to vector<2x32xf32>
    %42 = arith.mulf %39, %41 : vector<2x32xf32>
    %43 = arith.addf %27, %42 : vector<2x32xf32>
    %c2 = arith.constant 2 : index
    %44 = memref.load %arg2[%c2] : memref<49xf32, #tpu.memory_space<smem>>
    %45 = vector.broadcast %44 : f32 to vector<2x32xf32>
    %46 = arith.mulf %10, %45 : vector<2x32xf32>
    %c18 = arith.constant 18 : index
    %47 = memref.load %arg2[%c18] : memref<49xf32, #tpu.memory_space<smem>>
    %48 = vector.broadcast %47 : f32 to vector<2x32xf32>
    %49 = arith.addf %46, %48 : vector<2x32xf32>
    %50 = arith.negf %49 : vector<2x32xf32>
    %51 = math.exp %50 : vector<2x32xf32>
    %cst_8 = arith.constant 1.000000e+00 : f32
    %52 = vector.broadcast %cst_8 : f32 to vector<2x32xf32>
    %53 = arith.addf %52, %51 : vector<2x32xf32>
    %54 = arith.divf %52, %53 : vector<2x32xf32>
    %55 = arith.mulf %49, %54 : vector<2x32xf32>
    %c34 = arith.constant 34 : index
    %56 = memref.load %arg2[%c34] : memref<49xf32, #tpu.memory_space<smem>>
    %57 = vector.broadcast %56 : f32 to vector<2x32xf32>
    %58 = arith.mulf %55, %57 : vector<2x32xf32>
    %59 = arith.addf %43, %58 : vector<2x32xf32>
    %c3 = arith.constant 3 : index
    %60 = memref.load %arg2[%c3] : memref<49xf32, #tpu.memory_space<smem>>
    %61 = vector.broadcast %60 : f32 to vector<2x32xf32>
    %62 = arith.mulf %10, %61 : vector<2x32xf32>
    %c19 = arith.constant 19 : index
    %63 = memref.load %arg2[%c19] : memref<49xf32, #tpu.memory_space<smem>>
    %64 = vector.broadcast %63 : f32 to vector<2x32xf32>
    %65 = arith.addf %62, %64 : vector<2x32xf32>
    %66 = arith.negf %65 : vector<2x32xf32>
    %67 = math.exp %66 : vector<2x32xf32>
    %cst_9 = arith.constant 1.000000e+00 : f32
    %68 = vector.broadcast %cst_9 : f32 to vector<2x32xf32>
    %69 = arith.addf %68, %67 : vector<2x32xf32>
    %70 = arith.divf %68, %69 : vector<2x32xf32>
    %71 = arith.mulf %65, %70 : vector<2x32xf32>
    %c35 = arith.constant 35 : index
    %72 = memref.load %arg2[%c35] : memref<49xf32, #tpu.memory_space<smem>>
    %73 = vector.broadcast %72 : f32 to vector<2x32xf32>
    %74 = arith.mulf %71, %73 : vector<2x32xf32>
    %75 = arith.addf %59, %74 : vector<2x32xf32>
    %c4 = arith.constant 4 : index
    %76 = memref.load %arg2[%c4] : memref<49xf32, #tpu.memory_space<smem>>
    %77 = vector.broadcast %76 : f32 to vector<2x32xf32>
    %78 = arith.mulf %10, %77 : vector<2x32xf32>
    %c20 = arith.constant 20 : index
    %79 = memref.load %arg2[%c20] : memref<49xf32, #tpu.memory_space<smem>>
    %80 = vector.broadcast %79 : f32 to vector<2x32xf32>
    %81 = arith.addf %78, %80 : vector<2x32xf32>
    %82 = arith.negf %81 : vector<2x32xf32>
    %83 = math.exp %82 : vector<2x32xf32>
    %cst_10 = arith.constant 1.000000e+00 : f32
    %84 = vector.broadcast %cst_10 : f32 to vector<2x32xf32>
    %85 = arith.addf %84, %83 : vector<2x32xf32>
    %86 = arith.divf %84, %85 : vector<2x32xf32>
    %87 = arith.mulf %81, %86 : vector<2x32xf32>
    %c36 = arith.constant 36 : index
    %88 = memref.load %arg2[%c36] : memref<49xf32, #tpu.memory_space<smem>>
    %89 = vector.broadcast %88 : f32 to vector<2x32xf32>
    %90 = arith.mulf %87, %89 : vector<2x32xf32>
    %91 = arith.addf %75, %90 : vector<2x32xf32>
    %c5 = arith.constant 5 : index
    %92 = memref.load %arg2[%c5] : memref<49xf32, #tpu.memory_space<smem>>
    %93 = vector.broadcast %92 : f32 to vector<2x32xf32>
    %94 = arith.mulf %10, %93 : vector<2x32xf32>
    %c21 = arith.constant 21 : index
    %95 = memref.load %arg2[%c21] : memref<49xf32, #tpu.memory_space<smem>>
    %96 = vector.broadcast %95 : f32 to vector<2x32xf32>
    %97 = arith.addf %94, %96 : vector<2x32xf32>
    %98 = arith.negf %97 : vector<2x32xf32>
    %99 = math.exp %98 : vector<2x32xf32>
    %cst_11 = arith.constant 1.000000e+00 : f32
    %100 = vector.broadcast %cst_11 : f32 to vector<2x32xf32>
    %101 = arith.addf %100, %99 : vector<2x32xf32>
    %102 = arith.divf %100, %101 : vector<2x32xf32>
    %103 = arith.mulf %97, %102 : vector<2x32xf32>
    %c37 = arith.constant 37 : index
    %104 = memref.load %arg2[%c37] : memref<49xf32, #tpu.memory_space<smem>>
    %105 = vector.broadcast %104 : f32 to vector<2x32xf32>
    %106 = arith.mulf %103, %105 : vector<2x32xf32>
    %107 = arith.addf %91, %106 : vector<2x32xf32>
    %c6 = arith.constant 6 : index
    %108 = memref.load %arg2[%c6] : memref<49xf32, #tpu.memory_space<smem>>
    %109 = vector.broadcast %108 : f32 to vector<2x32xf32>
    %110 = arith.mulf %10, %109 : vector<2x32xf32>
    %c22 = arith.constant 22 : index
    %111 = memref.load %arg2[%c22] : memref<49xf32, #tpu.memory_space<smem>>
    %112 = vector.broadcast %111 : f32 to vector<2x32xf32>
    %113 = arith.addf %110, %112 : vector<2x32xf32>
    %114 = arith.negf %113 : vector<2x32xf32>
    %115 = math.exp %114 : vector<2x32xf32>
    %cst_12 = arith.constant 1.000000e+00 : f32
    %116 = vector.broadcast %cst_12 : f32 to vector<2x32xf32>
    %117 = arith.addf %116, %115 : vector<2x32xf32>
    %118 = arith.divf %116, %117 : vector<2x32xf32>
    %119 = arith.mulf %113, %118 : vector<2x32xf32>
    %c38 = arith.constant 38 : index
    %120 = memref.load %arg2[%c38] : memref<49xf32, #tpu.memory_space<smem>>
    %121 = vector.broadcast %120 : f32 to vector<2x32xf32>
    %122 = arith.mulf %119, %121 : vector<2x32xf32>
    %123 = arith.addf %107, %122 : vector<2x32xf32>
    %c7 = arith.constant 7 : index
    %124 = memref.load %arg2[%c7] : memref<49xf32, #tpu.memory_space<smem>>
    %125 = vector.broadcast %124 : f32 to vector<2x32xf32>
    %126 = arith.mulf %10, %125 : vector<2x32xf32>
    %c23 = arith.constant 23 : index
    %127 = memref.load %arg2[%c23] : memref<49xf32, #tpu.memory_space<smem>>
    %128 = vector.broadcast %127 : f32 to vector<2x32xf32>
    %129 = arith.addf %126, %128 : vector<2x32xf32>
    %130 = arith.negf %129 : vector<2x32xf32>
    %131 = math.exp %130 : vector<2x32xf32>
    %cst_13 = arith.constant 1.000000e+00 : f32
    %132 = vector.broadcast %cst_13 : f32 to vector<2x32xf32>
    %133 = arith.addf %132, %131 : vector<2x32xf32>
    %134 = arith.divf %132, %133 : vector<2x32xf32>
    %135 = arith.mulf %129, %134 : vector<2x32xf32>
    %c39 = arith.constant 39 : index
    %136 = memref.load %arg2[%c39] : memref<49xf32, #tpu.memory_space<smem>>
    %137 = vector.broadcast %136 : f32 to vector<2x32xf32>
    %138 = arith.mulf %135, %137 : vector<2x32xf32>
    %139 = arith.addf %123, %138 : vector<2x32xf32>
    %c8 = arith.constant 8 : index
    %140 = memref.load %arg2[%c8] : memref<49xf32, #tpu.memory_space<smem>>
    %141 = vector.broadcast %140 : f32 to vector<2x32xf32>
    %142 = arith.mulf %10, %141 : vector<2x32xf32>
    %c24 = arith.constant 24 : index
    %143 = memref.load %arg2[%c24] : memref<49xf32, #tpu.memory_space<smem>>
    %144 = vector.broadcast %143 : f32 to vector<2x32xf32>
    %145 = arith.addf %142, %144 : vector<2x32xf32>
    %146 = arith.negf %145 : vector<2x32xf32>
    %147 = math.exp %146 : vector<2x32xf32>
    %cst_14 = arith.constant 1.000000e+00 : f32
    %148 = vector.broadcast %cst_14 : f32 to vector<2x32xf32>
    %149 = arith.addf %148, %147 : vector<2x32xf32>
    %150 = arith.divf %148, %149 : vector<2x32xf32>
    %151 = arith.mulf %145, %150 : vector<2x32xf32>
    %c40 = arith.constant 40 : index
    %152 = memref.load %arg2[%c40] : memref<49xf32, #tpu.memory_space<smem>>
    %153 = vector.broadcast %152 : f32 to vector<2x32xf32>
    %154 = arith.mulf %151, %153 : vector<2x32xf32>
    %155 = arith.addf %139, %154 : vector<2x32xf32>
    %c9 = arith.constant 9 : index
    %156 = memref.load %arg2[%c9] : memref<49xf32, #tpu.memory_space<smem>>
    %157 = vector.broadcast %156 : f32 to vector<2x32xf32>
    %158 = arith.mulf %10, %157 : vector<2x32xf32>
    %c25 = arith.constant 25 : index
    %159 = memref.load %arg2[%c25] : memref<49xf32, #tpu.memory_space<smem>>
    %160 = vector.broadcast %159 : f32 to vector<2x32xf32>
    %161 = arith.addf %158, %160 : vector<2x32xf32>
    %162 = arith.negf %161 : vector<2x32xf32>
    %163 = math.exp %162 : vector<2x32xf32>
    %cst_15 = arith.constant 1.000000e+00 : f32
    %164 = vector.broadcast %cst_15 : f32 to vector<2x32xf32>
    %165 = arith.addf %164, %163 : vector<2x32xf32>
    %166 = arith.divf %164, %165 : vector<2x32xf32>
    %167 = arith.mulf %161, %166 : vector<2x32xf32>
    %c41 = arith.constant 41 : index
    %168 = memref.load %arg2[%c41] : memref<49xf32, #tpu.memory_space<smem>>
    %169 = vector.broadcast %168 : f32 to vector<2x32xf32>
    %170 = arith.mulf %167, %169 : vector<2x32xf32>
    %171 = arith.addf %155, %170 : vector<2x32xf32>
    %c10 = arith.constant 10 : index
    %172 = memref.load %arg2[%c10] : memref<49xf32, #tpu.memory_space<smem>>
    %173 = vector.broadcast %172 : f32 to vector<2x32xf32>
    %174 = arith.mulf %10, %173 : vector<2x32xf32>
    %c26 = arith.constant 26 : index
    %175 = memref.load %arg2[%c26] : memref<49xf32, #tpu.memory_space<smem>>
    %176 = vector.broadcast %175 : f32 to vector<2x32xf32>
    %177 = arith.addf %174, %176 : vector<2x32xf32>
    %178 = arith.negf %177 : vector<2x32xf32>
    %179 = math.exp %178 : vector<2x32xf32>
    %cst_16 = arith.constant 1.000000e+00 : f32
    %180 = vector.broadcast %cst_16 : f32 to vector<2x32xf32>
    %181 = arith.addf %180, %179 : vector<2x32xf32>
    %182 = arith.divf %180, %181 : vector<2x32xf32>
    %183 = arith.mulf %177, %182 : vector<2x32xf32>
    %c42 = arith.constant 42 : index
    %184 = memref.load %arg2[%c42] : memref<49xf32, #tpu.memory_space<smem>>
    %185 = vector.broadcast %184 : f32 to vector<2x32xf32>
    %186 = arith.mulf %183, %185 : vector<2x32xf32>
    %187 = arith.addf %171, %186 : vector<2x32xf32>
    %c11 = arith.constant 11 : index
    %188 = memref.load %arg2[%c11] : memref<49xf32, #tpu.memory_space<smem>>
    %189 = vector.broadcast %188 : f32 to vector<2x32xf32>
    %190 = arith.mulf %10, %189 : vector<2x32xf32>
    %c27 = arith.constant 27 : index
    %191 = memref.load %arg2[%c27] : memref<49xf32, #tpu.memory_space<smem>>
    %192 = vector.broadcast %191 : f32 to vector<2x32xf32>
    %193 = arith.addf %190, %192 : vector<2x32xf32>
    %194 = arith.negf %193 : vector<2x32xf32>
    %195 = math.exp %194 : vector<2x32xf32>
    %cst_17 = arith.constant 1.000000e+00 : f32
    %196 = vector.broadcast %cst_17 : f32 to vector<2x32xf32>
    %197 = arith.addf %196, %195 : vector<2x32xf32>
    %198 = arith.divf %196, %197 : vector<2x32xf32>
    %199 = arith.mulf %193, %198 : vector<2x32xf32>
    %c43 = arith.constant 43 : index
    %200 = memref.load %arg2[%c43] : memref<49xf32, #tpu.memory_space<smem>>
    %201 = vector.broadcast %200 : f32 to vector<2x32xf32>
    %202 = arith.mulf %199, %201 : vector<2x32xf32>
    %203 = arith.addf %187, %202 : vector<2x32xf32>
    %c12 = arith.constant 12 : index
    %204 = memref.load %arg2[%c12] : memref<49xf32, #tpu.memory_space<smem>>
    %205 = vector.broadcast %204 : f32 to vector<2x32xf32>
    %206 = arith.mulf %10, %205 : vector<2x32xf32>
    %c28 = arith.constant 28 : index
    %207 = memref.load %arg2[%c28] : memref<49xf32, #tpu.memory_space<smem>>
    %208 = vector.broadcast %207 : f32 to vector<2x32xf32>
    %209 = arith.addf %206, %208 : vector<2x32xf32>
    %210 = arith.negf %209 : vector<2x32xf32>
    %211 = math.exp %210 : vector<2x32xf32>
    %cst_18 = arith.constant 1.000000e+00 : f32
    %212 = vector.broadcast %cst_18 : f32 to vector<2x32xf32>
    %213 = arith.addf %212, %211 : vector<2x32xf32>
    %214 = arith.divf %212, %213 : vector<2x32xf32>
    %215 = arith.mulf %209, %214 : vector<2x32xf32>
    %c44 = arith.constant 44 : index
    %216 = memref.load %arg2[%c44] : memref<49xf32, #tpu.memory_space<smem>>
    %217 = vector.broadcast %216 : f32 to vector<2x32xf32>
    %218 = arith.mulf %215, %217 : vector<2x32xf32>
    %219 = arith.addf %203, %218 : vector<2x32xf32>
    %c13 = arith.constant 13 : index
    %220 = memref.load %arg2[%c13] : memref<49xf32, #tpu.memory_space<smem>>
    %221 = vector.broadcast %220 : f32 to vector<2x32xf32>
    %222 = arith.mulf %10, %221 : vector<2x32xf32>
    %c29 = arith.constant 29 : index
    %223 = memref.load %arg2[%c29] : memref<49xf32, #tpu.memory_space<smem>>
    %224 = vector.broadcast %223 : f32 to vector<2x32xf32>
    %225 = arith.addf %222, %224 : vector<2x32xf32>
    %226 = arith.negf %225 : vector<2x32xf32>
    %227 = math.exp %226 : vector<2x32xf32>
    %cst_19 = arith.constant 1.000000e+00 : f32
    %228 = vector.broadcast %cst_19 : f32 to vector<2x32xf32>
    %229 = arith.addf %228, %227 : vector<2x32xf32>
    %230 = arith.divf %228, %229 : vector<2x32xf32>
    %231 = arith.mulf %225, %230 : vector<2x32xf32>
    %c45 = arith.constant 45 : index
    %232 = memref.load %arg2[%c45] : memref<49xf32, #tpu.memory_space<smem>>
    %233 = vector.broadcast %232 : f32 to vector<2x32xf32>
    %234 = arith.mulf %231, %233 : vector<2x32xf32>
    %235 = arith.addf %219, %234 : vector<2x32xf32>
    %c14 = arith.constant 14 : index
    %236 = memref.load %arg2[%c14] : memref<49xf32, #tpu.memory_space<smem>>
    %237 = vector.broadcast %236 : f32 to vector<2x32xf32>
    %238 = arith.mulf %10, %237 : vector<2x32xf32>
    %c30 = arith.constant 30 : index
    %239 = memref.load %arg2[%c30] : memref<49xf32, #tpu.memory_space<smem>>
    %240 = vector.broadcast %239 : f32 to vector<2x32xf32>
    %241 = arith.addf %238, %240 : vector<2x32xf32>
    %242 = arith.negf %241 : vector<2x32xf32>
    %243 = math.exp %242 : vector<2x32xf32>
    %cst_20 = arith.constant 1.000000e+00 : f32
    %244 = vector.broadcast %cst_20 : f32 to vector<2x32xf32>
    %245 = arith.addf %244, %243 : vector<2x32xf32>
    %246 = arith.divf %244, %245 : vector<2x32xf32>
    %247 = arith.mulf %241, %246 : vector<2x32xf32>
    %c46 = arith.constant 46 : index
    %248 = memref.load %arg2[%c46] : memref<49xf32, #tpu.memory_space<smem>>
    %249 = vector.broadcast %248 : f32 to vector<2x32xf32>
    %250 = arith.mulf %247, %249 : vector<2x32xf32>
    %251 = arith.addf %235, %250 : vector<2x32xf32>
    %c15 = arith.constant 15 : index
    %252 = memref.load %arg2[%c15] : memref<49xf32, #tpu.memory_space<smem>>
    %253 = vector.broadcast %252 : f32 to vector<2x32xf32>
    %254 = arith.mulf %10, %253 : vector<2x32xf32>
    %c31 = arith.constant 31 : index
    %255 = memref.load %arg2[%c31] : memref<49xf32, #tpu.memory_space<smem>>
    %256 = vector.broadcast %255 : f32 to vector<2x32xf32>
    %257 = arith.addf %254, %256 : vector<2x32xf32>
    %258 = arith.negf %257 : vector<2x32xf32>
    %259 = math.exp %258 : vector<2x32xf32>
    %cst_21 = arith.constant 1.000000e+00 : f32
    %260 = vector.broadcast %cst_21 : f32 to vector<2x32xf32>
    %261 = arith.addf %260, %259 : vector<2x32xf32>
    %262 = arith.divf %260, %261 : vector<2x32xf32>
    %263 = arith.mulf %257, %262 : vector<2x32xf32>
    %c47 = arith.constant 47 : index
    %264 = memref.load %arg2[%c47] : memref<49xf32, #tpu.memory_space<smem>>
    %265 = vector.broadcast %264 : f32 to vector<2x32xf32>
    %266 = arith.mulf %263, %265 : vector<2x32xf32>
    %267 = arith.addf %251, %266 : vector<2x32xf32>
    %c48 = arith.constant 48 : index
    %268 = memref.load %arg2[%c48] : memref<49xf32, #tpu.memory_space<smem>>
    %269 = vector.broadcast %268 : f32 to vector<2x32xf32>
    %270 = arith.addf %267, %269 : vector<2x32xf32>
    %271 = arith.mulf %6, %270 : vector<2x32xf32>
    %272 = arith.mulf %7, %270 : vector<2x32xf32>
    %c128 = arith.constant 128 : index
    %c0_22 = arith.constant 0 : index
    %273 = vector.load %arg1[%c128, %c0_22] : memref<228x64xf32, #tpu.memory_space<vmem>>, vector<32x32xf32>
    %cst_23 = arith.constant dense<0.000000e+00> : vector<2x32xf32>
    %274 = tpu.matmul %271, %273, %cst_23 {dimension_numbers = #tpu.dot_dimension_numbers<[1], [0], [0], [1], [0, 0, 1, 1], [], []>, precision = #tpu.contract_precision<fp32>} : vector<2x32xf32>, vector<32x32xf32>, vector<2x32xf32> -> vector<2x32xf32>
    %c160 = arith.constant 160 : index
    %c0_24 = arith.constant 0 : index
    %275 = vector.load %arg1[%c160, %c0_24] : memref<228x64xf32, #tpu.memory_space<vmem>>, vector<32x32xf32>
    %cst_25 = arith.constant dense<0.000000e+00> : vector<2x32xf32>
    %276 = tpu.matmul %272, %275, %cst_25 {dimension_numbers = #tpu.dot_dimension_numbers<[1], [0], [0], [1], [0, 0, 1, 1], [], []>, precision = #tpu.contract_precision<fp32>} : vector<2x32xf32>, vector<32x32xf32>, vector<2x32xf32> -> vector<2x32xf32>
    %277 = arith.addf %274, %276 : vector<2x32xf32>
    %c225 = arith.constant 225 : index
    %c0_26 = arith.constant 0 : index
    %278 = vector.load %arg1[%c225, %c0_26] : memref<228x64xf32, #tpu.memory_space<vmem>>, vector<1x32xf32>
    %279 = vector.broadcast %278 : vector<1x32xf32> to vector<2x32xf32>
    %280 = arith.addf %277, %279 : vector<2x32xf32>
    %c192 = arith.constant 192 : index
    %c0_27 = arith.constant 0 : index
    %281 = vector.load %arg1[%c192, %c0_27] : memref<228x64xf32, #tpu.memory_space<vmem>>, vector<32x32xf32>
    %cst_28 = arith.constant dense<0.000000e+00> : vector<2x32xf32>
    %282 = tpu.matmul %280, %281, %cst_28 {dimension_numbers = #tpu.dot_dimension_numbers<[1], [0], [0], [1], [0, 0, 1, 1], [], []>, precision = #tpu.contract_precision<fp32>} : vector<2x32xf32>, vector<32x32xf32>, vector<2x32xf32> -> vector<2x32xf32>
    %cst_29 = arith.constant dense<0.000000e+00> : vector<32xf32>
    %283 = vector.multi_reduction <add>, %282, %cst_29 [0] : vector<2x32xf32> to vector<32xf32>
    %284 = vector.shape_cast %283 : vector<32xf32> to vector<1x32xf32>
    %cst_30 = arith.constant 5.000000e-01 : f32
    %285 = vector.broadcast %cst_30 : f32 to vector<1x32xf32>
    %286 = arith.mulf %284, %285 : vector<1x32xf32>
    %287 = vector.broadcast %286 : vector<1x32xf32> to vector<2x32xf32>
    %288 = arith.subf %280, %287 : vector<2x32xf32>
    %289 = arith.mulf %288, %288 : vector<2x32xf32>
    %cst_31 = arith.constant dense<0.000000e+00> : vector<2x32xf32>
    %290 = tpu.matmul %289, %281, %cst_31 {dimension_numbers = #tpu.dot_dimension_numbers<[1], [0], [0], [1], [0, 0, 1, 1], [], []>, precision = #tpu.contract_precision<fp32>} : vector<2x32xf32>, vector<32x32xf32>, vector<2x32xf32> -> vector<2x32xf32>
    %cst_32 = arith.constant dense<0.000000e+00> : vector<32xf32>
    %291 = vector.multi_reduction <add>, %290, %cst_32 [0] : vector<2x32xf32> to vector<32xf32>
    %292 = vector.shape_cast %291 : vector<32xf32> to vector<1x32xf32>
    %cst_33 = arith.constant 5.000000e-01 : f32
    %293 = vector.broadcast %cst_33 : f32 to vector<1x32xf32>
    %294 = arith.mulf %292, %293 : vector<1x32xf32>
    %c226 = arith.constant 226 : index
    %c0_34 = arith.constant 0 : index
    %295 = vector.load %arg1[%c226, %c0_34] : memref<228x64xf32, #tpu.memory_space<vmem>>, vector<1x32xf32>
    %c227 = arith.constant 227 : index
    %c0_35 = arith.constant 0 : index
    %296 = vector.load %arg1[%c227, %c0_35] : memref<228x64xf32, #tpu.memory_space<vmem>>, vector<1x32xf32>
    %297 = vector.broadcast %295 : vector<1x32xf32> to vector<2x32xf32>
    %298 = arith.mulf %297, %288 : vector<2x32xf32>
    %cst_36 = arith.constant 9.99999974E-6 : f32
    %299 = vector.broadcast %cst_36 : f32 to vector<1x32xf32>
    %300 = arith.addf %294, %299 : vector<1x32xf32>
    %301 = math.rsqrt %300 : vector<1x32xf32>
    %302 = vector.broadcast %301 : vector<1x32xf32> to vector<2x32xf32>
    %303 = arith.mulf %298, %302 : vector<2x32xf32>
    %304 = vector.broadcast %296 : vector<1x32xf32> to vector<2x32xf32>
    %305 = arith.addf %303, %304 : vector<2x32xf32>
    %c0_37 = arith.constant 0 : index
    %c0_38 = arith.constant 0 : index
    %306 = vector.load %arg3[%c0_37, %c0_38] : memref<2x32xf32, #tpu.memory_space<vmem>>, vector<2x32xf32>
    tpu.vector_store %arg3[%c0_37, %c0_38], %305 {strides = array<i32>} : memref<2x32xf32, #tpu.memory_space<vmem>>, vector<2x32xf32>,
    return
  }
}

</mosaic_0001>

<bundles_post_ra>
// kernel: linear_conductive.1
= control target key start
LH: loop header
LB: loop body
LE: loop exit
PB: predicated region body
PF: predicated region fallthrough
CT: control target
= control target key end

     0   :  { %8 = vsyncpa [#allocation3], 0  ;;  %s1846_s15 = smov [#allocation2]   ;;  %s2920_s0 = inlined_call_operand.vmem [shape: f32[2,128], index: 0, kind: input, shape index: {}]   ;;  %s2921_s1 = inlined_call_operand.vmem [shape: f32[228,64], index: 1, kind: input, shape index: {}]   ;;  %s2922_s2 = inlined_call_operand.vmem [shape: f32[49], index: 2, kind: input, shape index: {}]   ;;  %s2923_s3 = inlined_call_operand.vmem [shape: f32[2,32], index: 3, kind: output, shape index: {}]  }
   0x1   :  { %s18_s14 = sshll.u32 %s2922_s2, 4  ;;  %s19_s14 = int_to_ptr.vmem [resolvable:$true] %s18_s14 }
   0x2   :  { %21 = dma.vmem_to_smem %s19_s14, 16, %s1846_s15, [#allocation3]  }
   0x3   :  { %1844 = dma.done.wait [#allocation3], 16  }
   0x4   :  { %1845 = vsyncadd [#allocation3], 4294967280 }
   0x5   :  { %26 = sfence }
   0x6   :  { %v43_v0 = vld [vmem:[%s2921_s1 + $0x78] sm:$0xff]  ;;  %v42_v1 = vld [vmem:[%s2921_s1 + $0x70] sm:$0xff]  ;;  %v41_v2 = vld [vmem:[%s2921_s1 + $0x68] sm:$0xff]  ;;  %s1847_s22 = smov 96   ;;  %s393_s25 = sld [smem:[#allocation2]] }
   0x7   :  { %v1881_v3 = vand.u32 4294901760, %v43_v0  ;;  %v1883_v4 = vand.u32 4294901760, %v42_v1  ;;  %v1885_v5 = vand.u32 4294901760, %v41_v2  ;;  %v40_v6 = vld [vmem:[%s2921_s1 + $0x60] sm:$0xff]  ;;  %v39_v7 = vld [vmem:[%s2921_s1 + $0x58] sm:$0xff]  ;;  %v38_v8 = vld [vmem:[%s2921_s1 + $0x50] sm:$0xff] }
   0x8   :  { %v1896_v9 = vand.u32 4294901760, %v40_v6  ;;  %v1898_v10 = vand.u32 4294901760, %v39_v7  ;;  %v1900_v11 = vand.u32 4294901760, %v38_v8  ;;  %v37_v12 = vld [vmem:[%s2921_s1 + $0x48] sm:$0xff]  ;;  %v36_v13 = vld [vmem:[%s2921_s1 + $0x40] sm:$0xff]  ;;  %v35_v21 = vld [vmem:[%s2921_s1 + $0x38] sm:$0xff] }
   0x9   :  { %47 = vmatpush.msra.mxu0 %v1881_v3  ;;  %v1910_v14 = vsub.f32 %v43_v0, %v1881_v3  ;;  %v1913_v15 = vsub.f32 %v42_v1, %v1883_v4  ;;  %v1916_v16 = vsub.f32 %v41_v2, %v1885_v5  ;;  %v1918_v17 = vand.u32 4294901760, %v37_v12  ;;  %243 = vmatpush.msra.mxu3 %v1881_v3  ;;  %v34_v34 = vld [vmem:[%s2921_s1 + $0x30] sm:$0xff]  ;;  %v33_v35 = vld [vmem:[%s2921_s1 + $0x28] sm:$0xff]  ;;  %v32_v42 = vld [vmem:[%s2921_s1 + $0x20] sm:$0xff]  ;;  %s1698_s26 = sld [smem:[#allocation2 + $0x1]] }
   0xa   :  { %v1922_v18 = vsub.f32 %v40_v6, %v1896_v9  ;;  %v1925_v19 = vsub.f32 %v39_v7, %v1898_v10  ;;  %v1927_v20 = vand.u32 4294901760, %v36_v13  ;;  %v1937_v25 = vsub.f32 %v38_v8, %v1900_v11  ;;  %v31_v47 = vld [vmem:[%s2921_s1 + $0x18] sm:$0xff]  ;;  %v30_v53 = vld [vmem:[%s2921_s1 + $0x10] sm:$0xff]  ;;  %v29_v61 = vld [vmem:[%s2921_s1 + $0x8] sm:$0xff]  ;;  %s2179_s27 = sld [smem:[#allocation2 + $0x10]] }
   0xb   :  { %49 = vmatpush.msra.mxu0 %v1883_v4  ;;  %v89_v22 = vand.u32 4294901760, %v1910_v14  ;;  %v95_v23 = vand.u32 4294901760, %v1913_v15  ;;  %v101_v24 = vand.u32 4294901760, %v1916_v16  ;;  %190 = vmatpush.msra.mxu2 %v1910_v14  ;;  %v1943_v28 = vsub.f32 %v37_v12, %v1918_v17  ;;  %v28_v2 = vld [vmem:[%s2921_s1] sm:$0xff]  ;;  %s2181_s28 = sld [smem:[#allocation2 + $0x11]] }
   0xc   :  { %v107_v26 = vand.u32 4294901760, %v1922_v18  ;;  %v113_v27 = vand.u32 4294901760, %v1925_v19  ;;  %245 = vmatpush.msra.mxu3 %v1883_v4  ;;  %v1956_v32 = vand.u32 4294901760, %v35_v21  ;;  %v1960_v33 = vsub.f32 %v36_v13, %v1927_v20  ;;  %s1702_s29 = sld [smem:[#allocation2 + $0x2]] }
   0xd   :  { %v90_v29 = vsub.f32 %v1910_v14, %v89_v22  ;;  %51 = vmatpush.msra.mxu0 %v1885_v5  ;;  %v96_v30 = vsub.f32 %v1913_v15, %v95_v23  ;;  %v102_v31 = vsub.f32 %v1916_v16, %v101_v24  ;;  %193 = vmatpush.msra.mxu2 %v1913_v15  ;;  %v119_v39 = vand.u32 4294901760, %v1937_v25  ;;  %s2183_s30 = sld [smem:[#allocation2 + $0x12]] }
   0xe   :  { %247 = vmatpush.msra.mxu3 %v1885_v5  ;;  %v108_v38 = vsub.f32 %v1922_v18, %v107_v26  ;;  %v114_v40 = vsub.f32 %v1925_v19, %v113_v27  ;;  %v125_v41 = vand.u32 4294901760, %v1943_v28  ;;  %v1984_v44 = vand.u32 4294901760, %v34_v34  ;;  %s1706_s4 = sld [smem:[#allocation2 + $0x3]] }
   0xf   :  { %v91_v36 = vand.u32 4294901760, %v90_v29  ;;  %v97_v37 = vand.u32 4294901760, %v96_v30  ;;  %53 = vmatpush.msra.mxu0 %v1896_v9  ;;  %196 = vmatpush.msra.mxu2 %v1916_v16  ;;  %v103_v43 = vand.u32 4294901760, %v102_v31  ;;  %v1987_v45 = vsub.f32 %v35_v21, %v1956_v32  ;;  %v27_v29 = vld [vmem:[%s2920_s0] sm:$0x3]  ;;  %s2185_s5 = sld [smem:[#allocation2 + $0x13]] }
  0x10   :  { %249 = vmatpush.msra.mxu3 %v1896_v9  ;;  %v1989_v46 = vand.u32 4294901760, %v33_v35  ;;  %v131_v48 = vand.u32 4294901760, %v1960_v33  ;;  %v109_v49 = vand.u32 4294901760, %v108_v38  ;;  %v120_v50 = vsub.f32 %v1937_v25, %v119_v39  ;;  %s1710_s6 = sld [smem:[#allocation2 + $0x4]] }
  0x11   :  { %92 = vmatpush.msra.mxu1 %v91_v36  ;;  %55 = vmatpush.msra.mxu0 %v1898_v10  ;;  %v2002_v51 = vsub.f32 %v34_v34, %v1984_v44  ;;  %v2004_v52 = vand.u32 4294901760, %v32_v42  ;;  %v2009_v54 = vand.u32 4294901760, %v31_v47  ;;  %v115_v55 = vand.u32 4294901760, %v114_v40  ;;  %s1714_s7 = sld [smem:[#allocation2 + $0x5]] }
  0x12   :  { %199 = vmatpush.msra.mxu2 %v1922_v18  ;;  %251 = vmatpush.msra.mxu3 %v1898_v10  ;;  %v126_v56 = vsub.f32 %v1943_v28, %v125_v41  ;;  %v137_v57 = vand.u32 4294901760, %v1987_v45  ;;  %v2019_v58 = vsub.f32 %v33_v35, %v1989_v46  ;;  %v132_v59 = vsub.f32 %v1960_v33, %v131_v48  ;;  %s2187_s8 = sld [smem:[#allocation2 + $0x14]] }
  0x13   :  { %98 = vmatpush.msra.mxu1 %v97_v37  ;;  %57 = vmatpush.msra.mxu0 %v1900_v11  ;;  %v2024_v60 = vand.u32 4294901760, %v30_v53  ;;  %v121_v62 = vand.u32 4294901760, %v120_v50  ;;  %v143_v63 = vand.u32 4294901760, %v2002_v51  ;;  %v2034_v0 = vsub.f32 %v32_v42, %v2004_v52  ;;  %s2189_s9 = sld [smem:[#allocation2 + $0x15]] }
  0x14   :  { %202 = vmatpush.msra.mxu2 %v1925_v19  ;;  %253 = vmatpush.msra.mxu3 %v1900_v11  ;;  %v2037_v1 = vsub.f32 %v31_v47, %v2009_v54  ;;  %v127_v6 = vand.u32 4294901760, %v126_v56  ;;  %v138_v7 = vsub.f32 %v1987_v45, %v137_v57  ;;  %v149_v8 = vand.u32 4294901760, %v2019_v58  ;;  %s2191_s10 = sld [smem:[#allocation2 + $0x6]] }
  0x15   :  { %104 = vmatpush.msra.mxu1 %v103_v43  ;;  %59 = vmatpush.msra.mxu0 %v1918_v17  ;;  %v2049_v12 = vand.u32 4294901760, %v29_v61  ;;  %v133_v13 = vand.u32 4294901760, %v132_v59  ;;  %v2052_v21 = vsub.f32 %v30_v53, %v2024_v60  ;;  %v144_v30 = vsub.f32 %v2002_v51, %v143_v63  ;;  %s2200_s11 = sld [smem:[#allocation2 + $0x16]] }
  0x16   :  { %205 = vmatpush.msra.mxu2 %v1937_v25  ;;  %255 = vmatpush.msra.mxu3 %v1918_v17  ;;  %v155_v31 = vand.u32 4294901760, %v2034_v0  ;;  %v2064_v34 = vand.u32 4294901760, %v28_v2  ;;  %v2066_v35 = vand.u32 4294901760, %v27_v29  ;;  %v161_v36 = vand.u32 4294901760, %v2037_v1  ;;  %s2206_s12 = sld [smem:[#allocation2 + $0x7]] }
  0x17   :  { %110 = vmatpush.msra.mxu1 %v109_v49  ;;  %61 = vmatpush.msra.mxu0 %v1927_v20  ;;  %v139_v37 = vand.u32 4294901760, %v138_v7  ;;  %v150_v38 = vsub.f32 %v2019_v58, %v149_v8  ;;  %v2076_v40 = vsub.f32 %v29_v61, %v2049_v12  ;;  %v145_v43 = vand.u32 4294901760, %v144_v30  ;;  %s2211_s13 = sld [smem:[#allocation2 + $0x17]] }
  0x18   :  { %208 = vmatpush.msra.mxu2 %v1943_v28  ;;  %257 = vmatpush.msra.mxu3 %v1927_v20  ;;  %v79_v42 = vsub.f32 %v27_v29, %v2066_v35  ;;  %v156_v47 = vsub.f32 %v2034_v0, %v155_v31  ;;  %v167_v49 = vand.u32 4294901760, %v2052_v21  ;;  %v2087_v50 = vsub.f32 %v28_v2, %v2064_v34  ;;  %s2219_s14 = sld [smem:[#allocation2 + $0x8]] }
  0x19   :  { %116 = vmatpush.msra.mxu1 %v115_v55  ;;  %63 = vmatpush.msra.mxu0 %v1956_v32  ;;  %v151_v53 = vand.u32 4294901760, %v150_v38  ;;  %v162_v55 = vsub.f32 %v2037_v1, %v161_v36  ;;  %v173_v56 = vand.u32 4294901760, %v2076_v40  ;;  %v397_v28 = vstv %s2179_s27  ;;  %s2228_s15 = sld [smem:[#allocation2 + $0x9]] }
  0x1a   :  { %211 = vmatpush.msra.mxu2 %v1960_v33  ;;  %259 = vmatpush.msra.mxu3 %v1956_v32  ;;  %v80_v59 = vand.u32 4294901760, %v79_v42  ;;  %v157_v61 = vand.u32 4294901760, %v156_v47  ;;  %v179_v2 = vand.u32 4294901760, %v2087_v50  ;;  %v454_v33 = vstv %s1702_s29  ;;  %s2234_s16 = sld [smem:[#allocation2 + $0x18]] }
  0x1b   :  { %122 = vmatpush.msra.mxu1 %v121_v62  ;;  %65 = vmatpush.msra.mxu0 %v1984_v44  ;;  %v168_v62 = vsub.f32 %v2052_v21, %v167_v49  ;;  %v174_v7 = vsub.f32 %v2076_v40, %v173_v56  ;;  %s2238_s17 = sld [smem:[#allocation2 + $0x19]] }
  0x1c   :  { %214 = vmatpush.msra.mxu2 %v1987_v45  ;;  %261 = vmatpush.msra.mxu3 %v1984_v44  ;;  %v180_v30 = vsub.f32 %v2087_v50, %v179_v2  ;;  %v544_v45 = vstv %s1714_s7  ;;  %s2240_s18 = sld [smem:[#allocation2 + $0x20]] }
  0x1d   :  { %128 = vmatpush.msra.mxu1 %v127_v6  ;;  %67 = vmatpush.msra.mxu0 %v1989_v46  ;;  %v163_v6 = vand.u32 4294901760, %v162_v55  ;;  %v169_v29 = vand.u32 4294901760, %v168_v62  ;;  %s2245_s19 = sld [smem:[#allocation2 + $0xa]] }
  0x1e   :  { %217 = vmatpush.msra.mxu2 %v2002_v51  ;;  %263 = vmatpush.msra.mxu3 %v1989_v46  ;;  %v487_v51 = vstv %s2185_s5  ;;  %s2247_s20 = sld [smem:[#allocation2 + $0xb]] }
  0x1f   :  { %134 = vmatpush.msra.mxu1 %v133_v13  ;;  %69 = vmatpush.msra.mxu0 %v2004_v52  ;;  %v81_v13 = vsub.f32 %v79_v42, %v80_v59  ;;  %s2249_s21 = sld [smem:[#allocation2 + $0x21]] }
  0x20   :  { %220 = vmatpush.msra.mxu2 %v2019_v58  ;;  %265 = vmatpush.msra.mxu3 %v2004_v52  ;;  %s2253_s0 = sld [smem:[#allocation2 + $0x22]] }
  0x21   :  { %140 = vmatpush.msra.mxu1 %v139_v37  ;;  %71 = vmatpush.msra.mxu0 %v2009_v54  ;;  %v175_v37 = vand.u32 4294901760, %v174_v7  ;;  %v82_v38 = vand.u32 4294901760, %v81_v13  ;;  %v634_v7 = vstv %s2219_s14  ;;  %v664_v13 = vstv %s2228_s15  ;;  %s2259_s2 = sld [smem:[#allocation2 + $0x1a]] }
  0x22   :  { %223 = vmatpush.msra.mxu2 %v2034_v0  ;;  %267 = vmatpush.msra.mxu3 %v2009_v54  ;;  %s2263_s23 = sld [smem:[#allocation2 + $0x1b]] }
  0x23   :  { %146 = vmatpush.msra.mxu1 %v145_v43  ;;  %73 = vmatpush.msra.mxu0 %v2024_v60  ;;  %v181_v43 = vand.u32 4294901760, %v180_v30  ;;  %s2267_s24 = sld [smem:[#allocation2 + $0x23]] }
  0x24   :  { %226 = vmatpush.msra.mxu2 %v2037_v1  ;;  %269 = vmatpush.msra.mxu3 %v2024_v60  ;;  %s2428_s27 = sld [smem:[#allocation2 + $0x1c]] }
  0x25   :  { %152 = vmatpush.msra.mxu1 %v151_v53  ;;  %75 = vmatpush.msra.mxu0 %v2049_v12  ;;  %s2444_s29 = sld [smem:[#allocation2 + $0x26]] }
  0x26   :  { %229 = vmatpush.msra.mxu2 %v2052_v21  ;;  %271 = vmatpush.msra.mxu3 %v2049_v12  ;;  %s2484_s5 = sld [smem:[#allocation2 + $0x1d]] }
  0x27   :  { %158 = vmatpush.msra.mxu1 %v157_v61  ;;  %77 = vmatpush.msra.mxu0 %v2064_v34  ;;  %s2522_s7 = sld [smem:[#allocation2 + $0xe]] }
  0x28   :  { %232 = vmatpush.msra.mxu2 %v2076_v40  ;;  %273 = vmatpush.msra.mxu3 %v2064_v34  ;;  %s2682_s14 = sld [smem:[#allocation2 + $0x2c]] }
  0x29   :  { %284 = vmatpush.msrb.mxu0 %v89_v22  ;;  %164 = vmatpush.msra.mxu1 %v163_v6  ;;  %v607_v6 = vstv %s2211_s13  ;;  %s2648_s13 = sld [smem:[#allocation2 + $0x2b]] }
  0x2a   :  { %235 = vmatpush.msra.mxu2 %v2087_v50  ;;  %277 = vmatmul.f32.vlgmr.msra.gmra.mxu3 %v80_v59  ;;  %v604_v59 = vstv %s2206_s12  ;;  %s2639_s12 = sld [smem:[#allocation2 + $0x2a]] }
  0x2b   :  { %288 = vmatpush.msrb.mxu0 %v95_v23  ;;  %170 = vmatpush.msra.mxu1 %v169_v29  ;;  %v885_v23 = vld [vmem:[%s2921_s1 + $0x98] sm:$0xff] }
  0x2c   :  { %238 = vmatmul.f32.vlgmr.msra.gmra.mxu2 %v79_v42  ;;  %83 = vmatmul.f32.vlgmr.msra.gmra.mxu0 %v82_v38 }
  0x2d   :  { %292 = vmatpush.msrb.mxu0 %v101_v24  ;;  %176 = vmatpush.msra.mxu1 %v175_v37  ;;  %v2172_v24 = vand.u32 4294901760, %v885_v23 }
  0x2f   :  { %296 = vmatpush.msrb.mxu0 %v107_v26  ;;  %182 = vmatpush.msra.mxu1 %v181_v43  ;;  %v2175_v25 = vsub.f32 %v885_v23, %v2172_v24 }
  0x30   :  { %184 = vmatmul.f32.vlgmr.msra.gmra.mxu1 %v2066_v35 }
  0x31   :  { %351 = vmatpush.msrb.mxu1 %v1881_v3  ;;  %300 = vmatpush.msrb.mxu0 %v113_v27  ;;  %v1762_v3 = vld [vmem:[%s2921_s1 + $0xe0] ss:$0 sm:$0xff]  ;;  %v394_v27 = vstv %s393_s25  ;;  %s2284_s25 = sld [smem:[#allocation2 + $0xc]] }
  0x33   :  { %353 = vmatpush.msrb.mxu1 %v1883_v4  ;;  %304 = vmatpush.msrb.mxu0 %v119_v39 }
  0x35   :  { %355 = vmatpush.msrb.mxu1 %v1885_v5  ;;  %308 = vmatpush.msrb.mxu0 %v125_v41  ;;  %v484_v41 = vstv %s1706_s4  ;;  %s2473_s4 = sld [smem:[#allocation2 + $0x27]] }
  0x37   :  { %357 = vmatpush.msrb.mxu1 %v1896_v9  ;;  %312 = vmatpush.msrb.mxu0 %v131_v48  ;;  %v457_v48 = vstv %s2183_s30  ;;  %s2466_s30 = sld [smem:[#allocation2 + $0xd]] }
  0x39   :  { %359 = vmatpush.msrb.mxu1 %v1898_v10  ;;  %316 = vmatpush.msrb.mxu0 %v137_v57 }
  0x3b   :  { %361 = vmatpush.msrb.mxu1 %v1900_v11  ;;  %320 = vmatpush.msrb.mxu0 %v143_v63 }
  0x3d   :  { %363 = vmatpush.msrb.mxu1 %v1918_v17  ;;  %324 = vmatpush.msrb.mxu0 %v149_v8 }
  0x3f   :  { %365 = vmatpush.msrb.mxu1 %v1927_v20  ;;  %328 = vmatpush.msrb.mxu0 %v155_v31 }
  0x41   :  { %367 = vmatpush.msrb.mxu1 %v1956_v32  ;;  %332 = vmatpush.msrb.mxu0 %v161_v36  ;;  %v424_v32 = vstv %s1698_s26  ;;  %v574_v36 = vstv %s2191_s10  ;;  %s2387_s26 = sld [smem:[#allocation2 + $0x24]] }
  0x42   :  { %s2572_s10 = sld [smem:[#allocation2 + $0x1f]] }
  0x43   :  { %369 = vmatpush.msrb.mxu1 %v1984_v44  ;;  %336 = vmatpush.msrb.mxu0 %v167_v49  ;;  %v514_v44 = vstv %s1710_s6  ;;  %s2497_s6 = sld [smem:[#allocation2 + $0x28]] }
  0x45   :  { %371 = vmatpush.msrb.mxu1 %v1989_v46  ;;  %340 = vmatpush.msrb.mxu0 %v173_v56  ;;  %v427_v46 = vstv %s2181_s28  ;;  %v577_v56 = vstv %s2200_s11  ;;  %s2437_s28 = sld [smem:[#allocation2 + $0x25]] }
  0x46   :  { %s2623_s11 = sld [smem:[#allocation2 + $0x29]] }
  0x47   :  { %373 = vmatpush.msrb.mxu1 %v2004_v52  ;;  %344 = vmatpush.msrb.mxu0 %v179_v2  ;;  %v517_v52 = vstv %s2187_s8  ;;  %s2542_s8 = sld [smem:[#allocation2 + $0x1e]] }
  0x48   :  { %346 = vmatmul.f32.vlgmr.msrb.gmra.mxu0 %v2066_v35 }
  0x49   :  { %375 = vmatpush.msrb.mxu1 %v2009_v54  ;;  %1168 = vmatpush.msra.mxu0 %v2175_v25 }
  0x4b   :  { %377 = vmatpush.msrb.mxu1 %v2024_v60  ;;  %v547_v60 = vstv %s2189_s9  ;;  %s2547_s9 = sld [smem:[#allocation2 + $0xf]] }
  0x4d   :  { %379 = vmatpush.msrb.mxu1 %v2049_v12 }
  0x4f   :  { %381 = vmatpush.msrb.mxu1 %v2064_v34 }
  0x50   :  { %383 = vmatmul.f32.vlgmr.msrb.gmra.mxu1 %v2066_v35 }
  0x51   :  { %1197 = vmatpush.msra.mxu1 %v2172_v24 }
  0xa9   :  { %v84_v4 = vpop.f32.mrf.mxu0 }
  0xaa   :  { %v85_v5 = vadd.f32 %v1762_v3, %v84_v4 }
  0xad   :  { %v185_v9 = vpop.f32.mrf.mxu1  ;;  %v278_v15 = vpop.f32.mrf.mxu3 }
  0xae   :  { %v186_v10 = vadd.f32 %v185_v9, %v85_v5 }
  0xaf   :  { %v239_v11 = vpop.f32.mrf.mxu2 }
  0xb0   :  { %v240_v14 = vadd.f32 %v239_v11, %v186_v10  ;;  %v637_v11 = vstv %s2234_s16 }
  0xb2   :  { %v279_v16 = vadd.f32 %v278_v15, %v240_v14  ;;  %v667_v14 = vstv %s2238_s17 }
  0xc5   :  { %v347_v17 = vpop.f32.mrf.mxu0 }
  0xc6   :  { %v348_v18 = vadd.f32 %v347_v17, %v279_v16 }
  0xcd   :  { %v384_v19 = vpop.f32.mrf.mxu1 }
  0xce   :  { %v2164_v20 = vadd.f32 %v384_v19, %v348_v18  ;;  %v694_v18 = vstv %s2245_s19  ;;  %v724_v19 = vstv %s2247_s20 }
  0xd0   :  { %v387_v22 = vmul.f32 %v2164_v20, %v2164_v20 }
  0xd2   :  { %389 = vrot.lane.b32.xlu0 %v387_v22, %s1847_s22 }
 0x144   :  { %v390_v26 = vpop.permute.xlu0 %389 }
 0x145   :  { %v2194_v39 = vadd.f32 %v390_v26, %v387_v22 }
 0x147   :  { %v395_v54 = vmul.f32 %v394_v27, %v2194_v39  ;;  %v425_v57 = vmul.f32 %v424_v32, %v2194_v39  ;;  %v455_v58 = vmul.f32 %v454_v33, %v2194_v39  ;;  %v485_v63 = vmul.f32 %v484_v41, %v2194_v39 }
 0x148   :  { %v515_v0 = vmul.f32 %v514_v44, %v2194_v39  ;;  %v545_v1 = vmul.f32 %v544_v45, %v2194_v39  ;;  %v575_v53 = vmul.f32 %v574_v36, %v2194_v39  ;;  %v605_v62 = vmul.f32 %v604_v59, %v2194_v39 }
 0x149   :  { %v2213_v8 = vadd.f32 %v397_v28, %v395_v54  ;;  %v2215_v12 = vadd.f32 %v427_v46, %v425_v57  ;;  %v2217_v21 = vadd.f32 %v457_v48, %v455_v58  ;;  %v2221_v31 = vadd.f32 %v487_v51, %v485_v63 }
 0x14a   :  { %v2223_v34 = vadd.f32 %v517_v52, %v515_v0  ;;  %v2225_v35 = vadd.f32 %v547_v60, %v545_v1  ;;  %v2251_v61 = vadd.f32 %v577_v56, %v575_v53  ;;  %v2271_v4 = vadd.f32 %v607_v6, %v605_v62 }
 0x14b   :  { %v1696_v40 = vmul.f32 -1.442695, %v2213_v8  ;;  %v1700_v42 = vmul.f32 -1.442695, %v2215_v12  ;;  %v1704_v47 = vmul.f32 -1.442695, %v2217_v21  ;;  %v635_v5 = vmul.f32 %v634_v7, %v2194_v39 }
 0x14c   :  { %v1708_v49 = vmul.f32 -1.442695, %v2221_v31  ;;  %v1712_v50 = vmul.f32 -1.442695, %v2223_v34  ;;  %v1716_v55 = vmul.f32 -1.442695, %v2225_v35  ;;  %v665_v9 = vmul.f32 %v664_v13, %v2194_v39 }
 0x14d   :  { %1766 = vpow2.f32 %v1696_v40  ;;  %v1720_v43 = vmul.f32 -1.442695, %v2251_v61  ;;  %v1724_v23 = vmul.f32 -1.442695, %v2271_v4  ;;  %v2290_v26 = vadd.f32 %v637_v11, %v635_v5 }
 0x14e   :  { %1768 = vpow2.f32 %v1700_v42  ;;  %v2292_v27 = vadd.f32 %v667_v14, %v665_v9  ;;  %v695_v32 = vmul.f32 %v694_v18, %v2194_v39  ;;  %v725_v33 = vmul.f32 %v724_v19, %v2194_v39 }
 0x14f   :  { %1770 = vpow2.f32 %v1704_v47  ;;  %v420_v44 = vstv %s2240_s18  ;;  %v697_v45 = vstv %s2259_s2  ;;  %v727_v46 = vstv %s2263_s23  ;;  %s2748_s2 = sld [smem:[#allocation2 + $0x2f]] }
 0x150   :  { %1772 = vpow2.f32 %v1708_v49  ;;  %v450_v52 = vstv %s2249_s21  ;;  %v480_v54 = vstv %s2253_s0  ;;  %v510_v57 = vstv %s2267_s24  ;;  %s2718_s21 = sld [smem:[#allocation2 + $0x2d]]  ;;  %s1848_s24 = smov 32  }
 0x151   :  { %1774 = vpow2.f32 %v1712_v50  ;;  %v1728_v60 = vmul.f32 -1.442695, %v2290_v26  ;;  %v2310_v63 = vmul.f32 -1.442695, %v2292_v27  ;;  %v2313_v36 = vadd.f32 %v697_v45, %v695_v32  ;;  %s2739_s0 = sld [smem:[#allocation2 + $0x2e]] }
 0x152   :  { %1776 = vpow2.f32 %v1716_v55  ;;  %v2315_v40 = vadd.f32 %v727_v46, %v725_v33  ;;  %v754_v50 = vstv %s2284_s25  ;;  %s1758_s23 = sld [smem:[#allocation2 + $0x30]] }
 0x153   :  { %v1767_v2 = vpop.eup %1766 }
 0x154   :  { %v1769_v29 = vpop.eup %1768  ;;  %v2261_v30 = vadd.f32 1.0, %v1767_v2 }
 0x155   :  { %v1771_v37 = vpop.eup %1770  ;;  %v2265_v38 = vadd.f32 1.0, %v1769_v29 }
 0x156   :  { %v1773_v3 = vpop.eup %1772  ;;  %1778 = vrcp.f32 %v2261_v30  ;;  %v2278_v16 = vadd.f32 1.0, %v1771_v37  ;;  %vm408_vm0 = vweird.f32 %v2261_v30  ;;  %v412_v47 = vand.u32 2147483647, %v2261_v30 }
 0x157   :  { %v1775_v10 = vpop.eup %1774  ;;  %1780 = vrcp.f32 %v2265_v38  ;;  %v2280_v17 = vadd.f32 1.0, %v1773_v3  ;;  %v414_v56 = vand.u32 2147483648, %v2261_v30  ;;  %v442_v6 = vand.u32 2147483647, %v2265_v38 }
 0x158   :  { %v1777_v15 = vpop.eup %1776  ;;  %v2286_v22 = vadd.f32 1.0, %v1775_v10  ;;  %1782 = vpow2.f32 %v1720_v43  ;;  %v444_v29 = vand.u32 2147483648, %v2265_v38  ;;  %vm438_vm4 = vweird.f32 %v2265_v38 }
 0x159   :  { %1784 = vrcp.f32 %v2278_v16  ;;  %v2295_v28 = vadd.f32 1.0, %v1777_v15  ;;  %vm413_vm6 = vcmp.eq.f32.partialorder %v412_v47, 8.507059e+37  ;;  %vm443_vm7 = vcmp.eq.f32.partialorder %v442_v6, 8.507059e+37 }
 0x15a   :  { %1786 = vrcp.f32 %v2280_v17  ;;  %v445_v33 = vor.u32 1.1754944e-38, %v444_v29  ;;  %v474_v45 = vand.u32 2147483648, %v2278_v16  ;;  %vm468_vm9 = vweird.f32 %v2278_v16 }
 0x15b   :  { %1788 = vrcp.f32 %v2286_v22  ;;  %v502_v47 = vand.u32 2147483647, %v2280_v17  ;;  %vm498_vm12 = vweird.f32 %v2280_v17 }
 0x15c   :  { %v1779_v41 = vpop.eup %1778  ;;  %1790 = vpow2.f32 %v1724_v23  ;;  %v415_v23 = vor.u32 1.1754944e-38, %v414_v56  ;;  %v475_v29 = vor.u32 1.1754944e-38, %v474_v45 }
 0x15d   :  { %v1781_v48 = vpop.eup %1780  ;;  %v404_v51 = vmul.f32 %v1779_v41, %v2261_v30  ;;  %1792 = vrcp.f32 %v2295_v28  ;;  %vm409_vm1 = vweird.f32 %v1779_v41  ;;  %vm2392_vm15 = vcmp.eq.f32.partialorder %v502_v47, 8.507059e+37 }
 0x15e   :  { %v434_v58 = vmul.f32 %v1781_v48, %v2265_v38  ;;  %v1783_v0 = vpop.eup %1782  ;;  %vm439_vm2 = vweird.f32 %v1781_v48  ;;  %vm2337_vm3 = vmor %vm408_vm0, %vm409_vm1  ;;  %1794 = vpow2.f32 %v1728_v60  ;;  %vm528_vm0 = vweird.f32 %v2286_v22 }
 0x15f   :  { %v405_v1 = vsub.f32 1.0, %v404_v51  ;;  %v2317_v42 = vpop.eup %1784  ;;  %vm2347_vm5 = vmor %vm438_vm4, %vm439_vm2  ;;  %v2352_v19 = vadd.f32 1.0, %v1783_v0  ;;  %vm558_vm2 = vweird.f32 %v2295_v28 }
 0x160   :  { %v435_v49 = vsub.f32 1.0, %v434_v58  ;;  %v2322_v53 = vpop.eup %1786  ;;  %v464_v59 = vmul.f32 %v2317_v42, %v2278_v16  ;;  %vm469_vm8 = vweird.f32 %v2317_v42 }
 0x161   :  { %v406_v55 = vmul.f32 %v1779_v41, %v405_v1  ;;  %v2327_v62 = vpop.eup %1788  ;;  %v494_v7 = vmul.f32 %v2322_v53, %v2280_v17  ;;  %1796 = vrcp.f32 %v2352_v19  ;;  %vm2370_vm10 = vmor %vm468_vm9, %vm469_vm8  ;;  %vm499_vm13 = vweird.f32 %v2322_v53 }
 0x162   :  { %v436_v2 = vmul.f32 %v1781_v48, %v435_v49  ;;  %v465_v37 = vsub.f32 1.0, %v464_v59  ;;  %v524_v43 = vmul.f32 %v2327_v62, %v2286_v22  ;;  %v1791_v3 = vpop.eup %1790  ;;  %vm529_vm14 = vweird.f32 %v2327_v62  ;;  %vm2407_vm1 = vmor %vm498_vm12, %vm499_vm13 }
 0x163   :  { %v407_v13 = vadd.f32 %v1779_v41, %v406_v55  ;;  %v495_v10 = vsub.f32 1.0, %v494_v7  ;;  %v2342_v11 = vpop.eup %1792  ;;  %v2367_v49 = vadd.f32 1.0, %v1791_v3  ;;  %v1736_v55 = vmul.f32 -1.442695, %v2313_v36 }
 0x164   :  { %v437_v9 = vadd.f32 %v1781_v48, %v436_v2  ;;  %v466_v30 = vmul.f32 %v2317_v42, %v465_v37  ;;  %v525_v18 = vsub.f32 1.0, %v524_v43  ;;  %v554_v32 = vmul.f32 %v2342_v11, %v2295_v28  ;;  %v1795_v1 = vpop.eup %1794 }
 0x165   :  { %v411_v14 = vsel %vm2337_vm3, %v1779_v41, %v407_v13  ;;  %v472_v41 = vand.u32 2147483647, %v2278_v16  ;;  %v496_v58 = vmul.f32 %v2322_v53, %v495_v10  ;;  %v504_v16 = vand.u32 2147483648, %v2280_v17  ;;  %vm2422_vm3 = vmor %vm528_vm0, %vm529_vm14 }
 0x166   :  { %v441_v38 = vsel %vm2347_vm5, %v1781_v48, %v437_v9  ;;  %v416_v46 = vsel %vm413_vm6, %v415_v23, %v411_v14  ;;  %v467_v51 = vadd.f32 %v2317_v42, %v466_v30  ;;  %v526_v0 = vmul.f32 %v2327_v62, %v525_v18 }
 0x167   :  { %v446_v60 = vsel %vm443_vm7, %v445_v33, %v441_v38  ;;  %v555_v48 = vsub.f32 1.0, %v554_v32  ;;  %vm2374_vm11 = vcmp.eq.f32.partialorder %v472_v41, 8.507059e+37  ;;  %v418_v2 = vmul.f32 %v416_v46, %v2213_v8 }
 0x168   :  { %v448_v6 = vmul.f32 %v446_v60, %v2215_v12  ;;  %v471_v7 = vsel %vm2370_vm10, %v2317_v42, %v467_v51  ;;  %v497_v13 = vadd.f32 %v2322_v53, %v496_v58  ;;  %v527_v37 = vadd.f32 %v2327_v62, %v526_v0  ;;  %v2399_v42 = vpop.eup %1796 }
 0x169   :  { %v556_v43 = vmul.f32 %v2342_v11, %v555_v48  ;;  %v534_v12 = vand.u32 2147483648, %v2286_v22  ;;  %1798 = vrcp.f32 %v2367_v49  ;;  %v476_v3 = vsel %vm2374_vm11, %v475_v29, %v471_v7 }
 0x16a   :  { %v505_v9 = vor.u32 1.1754944e-38, %v504_v16  ;;  %v532_v10 = vand.u32 2147483647, %v2286_v22  ;;  %v421_v14 = vmul.f32 %v420_v44, %v418_v2  ;;  %v451_v15 = vmul.f32 %v450_v52, %v448_v6 }
 0x16b   :  { %v501_v30 = vsel %vm2407_vm1, %v2322_v53, %v497_v13  ;;  %v584_v18 = vmul.f32 %v2399_v42, %v2352_v19  ;;  %v531_v22 = vsel %vm2422_vm3, %v2327_v62, %v527_v37  ;;  %v557_v44 = vadd.f32 %v2342_v11, %v556_v43 }
 0x16c   :  { %vm559_vm4 = vweird.f32 %v2342_v11  ;;  %v564_v52 = vand.u32 2147483648, %v2295_v28  ;;  %v478_v53 = vmul.f32 %v476_v3, %v2217_v21  ;;  %v535_v23 = vor.u32 1.1754944e-38, %v534_v12 }
 0x16d   :  { %v585_v38 = vsub.f32 1.0, %v584_v18  ;;  %v2439_v32 = vadd.f32 1.0, %v1795_v1  ;;  %v506_v33 = vsel %vm2392_vm15, %v505_v9, %v501_v30  ;;  %vm533_vm5 = vcmp.eq.f32.partialorder %v532_v10, 8.507059e+37  ;;  %vm2454_vm6 = vmor %vm558_vm2, %vm559_vm4 }
 0x16e   :  { %v562_v62 = vand.u32 2147483647, %v2295_v28  ;;  %1800 = vpow2.f32 %v2310_v63  ;;  %v452_v21 = vadd.f32 %v451_v15, %v421_v14  ;;  %v536_v45 = vsel %vm533_vm5, %v535_v23, %v531_v22 }
 0x16f   :  { %v2447_v41 = vpop.eup %1798  ;;  %v540_v46 = vstv %s2387_s26  ;;  %1802 = vrcp.f32 %v2439_v32  ;;  %v561_v58 = vsel %vm2454_vm6, %v2342_v11, %v557_v44  ;;  %v565_v63 = vor.u32 1.1754944e-38, %v564_v52 }
 0x170   :  { %v586_v60 = vmul.f32 %v2399_v42, %v585_v38  ;;  %v755_v0 = vmul.f32 %v754_v50, %v2194_v39  ;;  %v481_v28 = vmul.f32 %v480_v54, %v478_v53  ;;  %v508_v48 = vmul.f32 %v506_v33, %v2221_v31 }
 0x171   :  { %v614_v1 = vmul.f32 %v2447_v41, %v2367_v49  ;;  %1804 = vpow2.f32 %v1736_v55  ;;  %v538_v11 = vmul.f32 %v536_v45, %v2223_v34  ;;  %vm563_vm7 = vcmp.eq.f32.partialorder %v562_v62, 8.507059e+37 }
 0x172   :  { %v592_v47 = vand.u32 2147483647, %v2352_v19  ;;  %v1740_v50 = vmul.f32 -1.442695, %v2315_v40  ;;  %v482_v56 = vadd.f32 %v481_v28, %v452_v21  ;;  %v566_v54 = vsel %vm563_vm7, %v565_v63, %v561_v58 }
 0x173   :  { %v594_v31 = vand.u32 2147483648, %v2352_v19  ;;  %v757_v59 = vstv %s2428_s27  ;;  %v587_v2 = vadd.f32 %v2399_v42, %v586_v60  ;;  %vm589_vm8 = vweird.f32 %v2399_v42 }
 0x174   :  { %v1801_v16 = vpop.eup %1800  ;;  %1806 = vpow2.f32 %v1740_v50  ;;  %v2482_v55 = vadd.f32 %v757_v59, %v755_v0  ;;  %v511_v6 = vmul.f32 %v510_v57, %v508_v48  ;;  %v570_v7 = vstv %s2437_s28 }
 0x175   :  { %v2486_v34 = vpop.eup %1802  ;;  %v615_v13 = vsub.f32 1.0, %v614_v1  ;;  %v2491_v29 = vadd.f32 1.0, %v1801_v16  ;;  %vm588_vm9 = vweird.f32 %v2352_v19  ;;  %v600_v37 = vstv %s2444_s29 }
 0x176   :  { %v644_v43 = vmul.f32 %v2486_v34, %v2439_v32  ;;  %v1744_v8 = vmul.f32 -1.442695, %v2482_v55  ;;  %v512_v3 = vadd.f32 %v511_v6, %v482_v56  ;;  %v541_v5 = vmul.f32 %v540_v46, %v538_v11  ;;  %vm2503_vm10 = vmor %vm588_vm9, %vm589_vm8 }
 0x177   :  { %v1805_v12 = vpop.eup %1804  ;;  %v568_v57 = vmul.f32 %v566_v54, %v2225_v35  ;;  %vm618_vm11 = vweird.f32 %v2367_v49  ;;  %1808 = vrcp.f32 %v2491_v29  ;;  %v591_v19 = vsel %vm2503_vm10, %v2399_v42, %v587_v2 }
 0x178   :  { %vm593_vm12 = vcmp.eq.f32.partialorder %v592_v47, 8.507059e+37  ;;  %v595_v10 = vor.u32 1.1754944e-38, %v594_v31  ;;  %v2512_v14 = vadd.f32 1.0, %v1805_v12  ;;  %v616_v35 = vmul.f32 %v2447_v41, %v615_v13 }
 0x179   :  { %v645_v15 = vsub.f32 1.0, %v644_v43  ;;  %1810 = vpow2.f32 %v1744_v8  ;;  %v784_v30 = vstv %s2466_s30  ;;  %v622_v18 = vand.u32 2147483647, %v2367_v49 }
 0x17a   :  { %v1807_v17 = vpop.eup %1806  ;;  %v624_v22 = vand.u32 2147483648, %v2367_v49  ;;  %v630_v44 = vstv %s2473_s4  ;;  %1812 = vrcp.f32 %v2512_v14  ;;  %v542_v52 = vadd.f32 %v541_v5, %v512_v3 }
 0x17b   :  { %v571_v42 = vmul.f32 %v570_v7, %v568_v57  ;;  %v596_v53 = vsel %vm593_vm12, %v595_v10, %v591_v19  ;;  %v2520_v23 = vadd.f32 1.0, %v1807_v17  ;;  %v652_v38 = vand.u32 2147483647, %v2439_v32 }
 0x17c   :  { %v654_v33 = vand.u32 2147483648, %v2439_v32  ;;  %v785_v62 = vmul.f32 %v784_v30, %v2194_v39  ;;  %v787_v21 = vstv %s2484_s5  ;;  %v617_v46 = vadd.f32 %v2447_v41, %v616_v35 }
 0x17d   :  { %v2528_v45 = vpop.eup %1808  ;;  %vm619_vm13 = vweird.f32 %v2447_v41  ;;  %v646_v51 = vmul.f32 %v2486_v34, %v645_v15  ;;  %1814 = vrcp.f32 %v2520_v23  ;;  %v598_v58 = vmul.f32 %v596_v53, %v2251_v61 }
 0x17e   :  { %vm2535_vm14 = vcmp.eq.f32.partialorder %v622_v18, 8.507059e+37  ;;  %v660_v60 = vstv %s2497_s6  ;;  %v674_v0 = vmul.f32 %v2528_v45, %v2491_v29  ;;  %v572_v48 = vadd.f32 %v571_v42, %v542_v52  ;;  %vm2555_vm0 = vmor %vm618_vm11, %vm619_vm13 }
 0x17f   :  { %v1811_v28 = vpop.eup %1810  ;;  %v625_v1 = vor.u32 1.1754944e-38, %v624_v22  ;;  %vm648_vm15 = vweird.f32 %v2439_v32  ;;  %v2545_v11 = vadd.f32 %v787_v21, %v785_v62  ;;  %vm2559_vm1 = vcmp.eq.f32.partialorder %v652_v38, 8.507059e+37 }
 0x180   :  { %v2549_v61 = vpop.eup %1812  ;;  %v655_v56 = vor.u32 1.1754944e-38, %v654_v33  ;;  %v675_v54 = vsub.f32 1.0, %v674_v0  ;;  %v2563_v31 = vadd.f32 1.0, %v1811_v28  ;;  %v621_v59 = vsel %vm2555_vm0, %v2447_v41, %v617_v46 }
 0x181   :  { %v647_v16 = vadd.f32 %v2486_v34, %v646_v51  ;;  %vm649_vm2 = vweird.f32 %v2486_v34  ;;  %v704_v49 = vmul.f32 %v2549_v61, %v2512_v14  ;;  %v601_v2 = vmul.f32 %v600_v37, %v598_v58 }
 0x182   :  { %v676_v6 = vmul.f32 %v2528_v45, %v675_v54  ;;  %v682_v7 = vand.u32 2147483647, %v2491_v29  ;;  %1816 = vrcp.f32 %v2563_v31  ;;  %v684_v41 = vand.u32 2147483648, %v2491_v29  ;;  %vm2586_vm3 = vmor %vm648_vm15, %vm649_vm2 }
 0x183   :  { %v2577_v13 = vpop.eup %1814  ;;  %v705_v43 = vsub.f32 1.0, %v704_v49  ;;  %v1748_v8 = vmul.f32 -1.442695, %v2545_v11  ;;  %v814_v12 = vstv %s2522_s7  ;;  %v602_v3 = vadd.f32 %v601_v2, %v572_v48 }
 0x184   :  { %v626_v37 = vsel %vm2535_vm14, %v625_v1, %v621_v59  ;;  %vm678_vm4 = vweird.f32 %v2491_v29  ;;  %v734_v57 = vmul.f32 %v2577_v13, %v2520_v23  ;;  %v651_v9 = vsel %vm2586_vm3, %v2486_v34, %v647_v16 }
 0x185   :  { %vm679_vm5 = vweird.f32 %v2528_v45  ;;  %v706_v19 = vmul.f32 %v2549_v61, %v705_v43  ;;  %1818 = vpow2.f32 %v1748_v8  ;;  %v677_v32 = vadd.f32 %v2528_v45, %v676_v6 }
 0x186   :  { %v735_v10 = vsub.f32 1.0, %v734_v57  ;;  %v815_v35 = vmul.f32 %v814_v12, %v2194_v39  ;;  %v817_v15 = vstv %s2542_s8  ;;  %v628_v30 = vmul.f32 %v626_v37, %v2271_v4  ;;  %vm2619_vm7 = vmor %vm678_vm4, %vm679_vm5  ;;  %v882_v4 = vld [vmem:[%s2921_s1 + $0x80] sm:$0xff] }
 0x187   :  { %vm2602_vm6 = vcmp.eq.f32.partialorder %v682_v7, 8.507059e+37  ;;  %v685_v18 = vor.u32 1.1754944e-38, %v684_v41  ;;  %v844_v34 = vstv %s2547_s9  ;;  %v656_v52 = vsel %vm2559_vm1, %v655_v56, %v651_v9 }
 0x188   :  { %v2607_v22 = vpop.eup %1816  ;;  %v714_v42 = vand.u32 2147483648, %v2512_v14  ;;  %v2612_v53 = vadd.f32 %v817_v15, %v815_v35  ;;  %v845_v38 = vmul.f32 %v844_v34, %v2194_v39  ;;  %v707_v33 = vadd.f32 %v2549_v61, %v706_v19 }
 0x189   :  { %vm709_vm8 = vweird.f32 %v2549_v61  ;;  %v764_v62 = vmul.f32 %v2607_v22, %v2563_v31  ;;  %v847_v21 = vstv %s2572_s10  ;;  %v681_v39 = vsel %vm2619_vm7, %v2528_v45, %v677_v32 }
 0x18a   :  { %vm708_vm9 = vweird.f32 %v2512_v14  ;;  %v736_v29 = vmul.f32 %v2577_v13, %v735_v10  ;;  %v1752_v46 = vmul.f32 -1.442695, %v2612_v53  ;;  %v631_v58 = vmul.f32 %v630_v44, %v628_v30 }
 0x18b   :  { %v1819_v51 = vpop.eup %1818  ;;  %v712_v63 = vand.u32 2147483647, %v2512_v14  ;;  %v765_v0 = vsub.f32 1.0, %v764_v62  ;;  %v2641_v28 = vadd.f32 %v847_v21, %v845_v38  ;;  %v658_v48 = vmul.f32 %v656_v52, %v2290_v26  ;;  %vm2644_vm10 = vmor %vm708_vm9, %vm709_vm8 }
 0x18c   :  { %v715_v1 = vor.u32 1.1754944e-38, %v714_v42  ;;  %v2650_v47 = vadd.f32 1.0, %v1819_v51  ;;  %1820 = vpow2.f32 %v1752_v46  ;;  %v686_v14 = vsel %vm2602_vm6, %v685_v18, %v681_v39 }
 0x18d   :  { %v711_v44 = vsel %vm2644_vm10, %v2549_v61, %v707_v33  ;;  %v766_v26 = vmul.f32 %v2607_v22, %v765_v0  ;;  %v1756_v50 = vmul.f32 -1.442695, %v2641_v28  ;;  %v632_v56 = vadd.f32 %v631_v58, %v602_v3 }
 0x18e   :  { %v737_v54 = vadd.f32 %v2577_v13, %v736_v29  ;;  %vm739_vm11 = vweird.f32 %v2577_v13  ;;  %1822 = vrcp.f32 %v2650_v47  ;;  %vm713_vm12 = vcmp.eq.f32.partialorder %v712_v63, 8.507059e+37 }
 0x18f   :  { %vm738_vm13 = vweird.f32 %v2520_v23  ;;  %v744_v59 = vand.u32 2147483648, %v2520_v23  ;;  %1824 = vpow2.f32 %v1756_v50  ;;  %v661_v16 = vmul.f32 %v660_v60, %v658_v48 }
 0x190   :  { %v688_v61 = vmul.f32 %v686_v14, %v2292_v27  ;;  %v716_v49 = vsel %vm713_vm12, %v715_v1, %v711_v44  ;;  %v742_v2 = vand.u32 2147483647, %v2520_v23  ;;  %v690_v6 = vstv %s2623_s11  ;;  %vm2669_vm14 = vmor %vm738_vm13, %vm739_vm11 }
 0x191   :  { %v767_v41 = vadd.f32 %v2607_v22, %v766_v26  ;;  %vm769_vm15 = vweird.f32 %v2607_v22  ;;  %v662_v8 = vadd.f32 %v661_v16, %v632_v56  ;;  %v741_v27 = vsel %vm2669_vm14, %v2577_v13, %v737_v54 }
 0x192   :  { %v1821_v43 = vpop.eup %1820  ;;  %v772_v60 = vand.u32 2147483647, %v2563_v31  ;;  %v774_v23 = vand.u32 2147483648, %v2563_v31  ;;  %v718_v12 = vmul.f32 %v716_v49, %v2313_v36  ;;  %v745_v3 = vor.u32 1.1754944e-38, %v744_v59  ;;  %v884_v36 = vld [vmem:[%s2921_s1 + $0x90] sm:$0xff] }
 0x193   :  { %vm768_vm0 = vweird.f32 %v2563_v31  ;;  %v2684_v37 = vadd.f32 1.0, %v1821_v43  ;;  %v691_v57 = vmul.f32 %v690_v6, %v688_v61  ;;  %v720_v9 = vstv %s2639_s12  ;;  %v883_v31 = vld [vmem:[%s2921_s1 + $0x88] sm:$0xff] }
 0x194   :  { %v1823_v5 = vpop.eup %1822  ;;  %vm743_vm1 = vcmp.eq.f32.partialorder %v742_v2, 8.507059e+37  ;;  %v750_v19 = vstv %s2648_s13  ;;  %vm2690_vm2 = vmor %vm768_vm0, %vm769_vm15  ;;  %vm773_vm3 = vcmp.eq.f32.partialorder %v772_v60, 8.507059e+37  ;;  %v775_v17 = vor.u32 1.1754944e-38, %v774_v23 }
 0x195   :  { %v1825_v32 = vpop.eup %1824  ;;  %v746_v10 = vsel %vm743_vm1, %v745_v3, %v741_v27  ;;  %v771_v35 = vsel %vm2690_vm2, %v2607_v22, %v767_v41  ;;  %v794_v15 = vmul.f32 %v1823_v5, %v2650_v47  ;;  %1826 = vrcp.f32 %v2684_v37 }
 0x196   :  { %v692_v30 = vadd.f32 %v691_v57, %v662_v8  ;;  %v2705_v18 = vadd.f32 1.0, %v1825_v32  ;;  %v721_v34 = vmul.f32 %v720_v9, %v718_v12  ;;  %v2707_v42 = vand.u32 4294901760, %v884_v36 }
 0x197   :  { %v795_v52 = vsub.f32 1.0, %v794_v15  ;;  %v2709_v38 = vand.u32 4294901760, %v883_v31  ;;  %v748_v22 = vmul.f32 %v746_v10, %v2315_v40  ;;  %v776_v33 = vsel %vm773_vm3, %v775_v17, %v771_v35 }
 0x198   :  { %v804_v62 = vand.u32 2147483648, %v2650_v47  ;;  %1828 = vrcp.f32 %v2705_v18  ;;  %vm799_vm4 = vweird.f32 %v1823_v5  ;;  %v802_v39 = vand.u32 2147483647, %v2650_v47  ;;  %1199 = vmatpush.msra.mxu1 %v2707_v42 }
 0x199   :  { %v796_v21 = vmul.f32 %v1823_v5, %v795_v52  ;;  %v2721_v29 = vsub.f32 %v884_v36, %v2707_v42  ;;  %v722_v46 = vadd.f32 %v721_v34, %v692_v30  ;;  %v2725_v51 = vsub.f32 %v883_v31, %v2709_v38 }
 0x19a   :  { %v2727_v40 = vand.u32 4294901760, %v882_v4  ;;  %v778_v63 = vmul.f32 %v776_v33, %v2482_v55  ;;  %v780_v0 = vstv %s2682_s14  ;;  %vm798_vm5 = vweird.f32 %v2650_v47  ;;  %1201 = vmatpush.msra.mxu1 %v2709_v38  ;;  %v889_v33 = vld [vmem:[%s2921_s1 + $0xb8] sm:$0xff] }
 0x19b   :  { %v1827_v58 = vpop.eup %1826  ;;  %v797_v48 = vadd.f32 %v1823_v5, %v796_v21  ;;  %1171 = vmatpush.msra.mxu0 %v2721_v29  ;;  %v751_v45 = vmul.f32 %v750_v19, %v748_v22  ;;  %vm800_vm6 = vmor %vm798_vm5, %vm799_vm4  ;;  %v805_v1 = vor.u32 1.1754944e-38, %v804_v62  ;;  %vm803_vm7 = vcmp.eq.f32.partialorder %v802_v39, 8.507059e+37  ;;  %v888_v62 = vld [vmem:[%s2921_s1 + $0xb0] sm:$0xff] }
 0x19c   :  { %v824_v14 = vmul.f32 %v1827_v58, %v2684_v37  ;;  %v2737_v44 = vsub.f32 %v882_v4, %v2727_v40  ;;  %1203 = vmatpush.msra.mxu1 %v2727_v40  ;;  %v781_v54 = vmul.f32 %v780_v0, %v778_v63  ;;  %v834_v59 = vand.u32 2147483648, %v2684_v37 }
 0x19d   :  { %v801_v26 = vsel %vm800_vm6, %v1823_v5, %v797_v48  ;;  %1174 = vmatpush.msra.mxu0 %v2725_v51  ;;  %v752_v47 = vadd.f32 %v751_v45, %v722_v46  ;;  %vm829_vm8 = vweird.f32 %v1827_v58  ;;  %v832_v2 = vand.u32 2147483647, %v2684_v37 }
 0x19e   :  { %v1829_v55 = vpop.eup %1828  ;;  %v806_v50 = vsel %vm803_vm7, %v805_v1, %v801_v26  ;;  %v825_v56 = vsub.f32 1.0, %v824_v14  ;;  %v810_v6 = vstv %s2718_s21  ;;  %vm828_vm9 = vweird.f32 %v2684_v37 }
 0x19f   :  { %v854_v16 = vmul.f32 %v1829_v55, %v2705_v18  ;;  %1177 = vmatpush.msra.mxu0 %v2737_v44  ;;  %v808_v61 = vmul.f32 %v806_v50, %v2545_v11  ;;  %v782_v41 = vadd.f32 %v781_v54, %v752_v47  ;;  %v864_v8 = vand.u32 2147483648, %v2705_v18  ;;  %vm830_vm10 = vmor %vm828_vm9, %vm829_vm8  ;;  %v887_v47 = vld [vmem:[%s2921_s1 + $0xa8] sm:$0xff]  ;;  %v886_v50 = vld [vmem:[%s2921_s1 + $0xa0] sm:$0xff] }
 0x1a0   :  { %v826_v49 = vmul.f32 %v1827_v58, %v825_v56  ;;  %v835_v27 = vor.u32 1.1754944e-38, %v834_v59  ;;  %vm859_vm11 = vweird.f32 %v1829_v55  ;;  %v862_v11 = vand.u32 2147483647, %v2705_v18 }
 0x1a1   :  { %v855_v7 = vsub.f32 1.0, %v854_v16  ;;  %v811_v23 = vmul.f32 %v810_v6, %v808_v61  ;;  %vm833_vm12 = vcmp.eq.f32.partialorder %v832_v2, 8.507059e+37  ;;  %v840_v5 = vstv %s2739_s0 }
 0x1a2   :  { %v827_v43 = vadd.f32 %v1827_v58, %v826_v49  ;;  %vm858_vm13 = vweird.f32 %v2705_v18  ;;  %v865_v19 = vor.u32 1.1754944e-38, %v864_v8  ;;  %vm863_vm15 = vcmp.eq.f32.partialorder %v862_v11, 8.507059e+37 }
 0x1a3   :  { %v856_v60 = vmul.f32 %v1829_v55, %v855_v7  ;;  %v812_v9 = vadd.f32 %v811_v23, %v782_v41  ;;  %vm860_vm14 = vmor %vm858_vm13, %vm859_vm11  ;;  %v870_v32 = vstv %s2748_s2  ;;  %v874_v30 = vstv %s1758_s23 }
 0x1a4   :  { %v831_v12 = vsel %vm830_vm10, %v1827_v58, %v827_v43  ;;  %vm893_vm0 = vcmask 261120   ;;  %v908_v21 = vand.u32 4294901760, %v889_v33  ;;  %v910_v39 = vand.u32 4294901760, %v888_v62 }
 0x1a5   :  { %v836_v3 = vsel %vm833_vm12, %v835_v27, %v831_v12  ;;  %v857_v57 = vadd.f32 %v1829_v55, %v856_v60  ;;  %v912_v56 = vand.u32 4294901760, %v887_v47  ;;  %v914_v54 = vand.u32 4294901760, %v886_v50 }
 0x1a6   :  { %v838_v37 = vmul.f32 %v836_v3, %v2612_v53  ;;  %v2772_v46 = vsub.f32 %v889_v33, %v908_v21  ;;  %v2774_v58 = vsub.f32 %v888_v62, %v910_v39  ;;  %909 = vmatpush.msrb.mxu2 %v908_v21  ;;  %v1127_v8 = vand.u32 4294901760, %v2175_v25 }
 0x1a7   :  { %v861_v13 = vsel %vm860_vm14, %v1829_v55, %v857_v57  ;;  %v950_v59 = vsub.f32 %v887_v47, %v912_v56  ;;  %v956_v16 = vsub.f32 %v886_v50, %v914_v54  ;;  %v1133_v60 = vand.u32 4294901760, %v2721_v29 }
 0x1a8   :  { %v841_v36 = vmul.f32 %v840_v5, %v838_v37  ;;  %v866_v31 = vsel %vm863_vm15, %v865_v19, %v861_v13  ;;  %v939_v63 = vand.u32 4294901760, %v2772_v46  ;;  %v945_v0 = vand.u32 4294901760, %v2774_v58  ;;  %911 = vmatpush.msrb.mxu2 %v910_v39 }
 0x1a9   :  { %v868_v10 = vmul.f32 %v866_v31, %v2641_v28  ;;  %v951_v61 = vand.u32 4294901760, %v950_v59  ;;  %v957_v49 = vand.u32 4294901760, %v956_v16  ;;  %v1128_v23 = vsub.f32 %v2175_v25, %v1127_v8 }
 0x1aa   :  { %v842_v35 = vadd.f32 %v841_v36, %v812_v9  ;;  %v940_v48 = vsub.f32 %v2772_v46, %v939_v63  ;;  %v946_v45 = vsub.f32 %v2774_v58, %v945_v0  ;;  %913 = vmatpush.msrb.mxu2 %v912_v56  ;;  %v1139_v12 = vand.u32 4294901760, %v2725_v51 }
 0x1ab   :  { %v871_v15 = vmul.f32 %v870_v32, %v868_v10  ;;  %v958_v2 = vsub.f32 %v956_v16, %v957_v49  ;;  %v1134_v5 = vsub.f32 %v2721_v29, %v1133_v60  ;;  %v1145_v57 = vand.u32 4294901760, %v2737_v44  ;;  %v1273_v32 = vld [vmem:[%s2921_s1 + $0xc8] sm:$0xff] }
 0x1ac   :  { %v941_v1 = vand.u32 4294901760, %v940_v48  ;;  %v947_v14 = vand.u32 4294901760, %v946_v45  ;;  %915 = vmatpush.msrb.mxu2 %v914_v54  ;;  %v1129_v37 = vand.u32 4294901760, %v1128_v23  ;;  %v1140_v19 = vsub.f32 %v2725_v51, %v1139_v12 }
 0x1ad   :  { %v872_v17 = vadd.f32 %v871_v15, %v842_v35  ;;  %v959_v7 = vand.u32 4294901760, %v958_v2  ;;  %v1135_v36 = vand.u32 4294901760, %v1134_v5  ;;  %v1146_v31 = vsub.f32 %v2737_v44, %v1145_v57  ;;  %v1274_v44 = vld [vmem:[%s2921_s1 + $0xd0] sm:$0xff] }
 0x1ae   :  { %942 = vmatpush.msrb.mxu3 %v941_v1  ;;  %980 = vmatpush.msra.mxu2 %v2772_v46  ;;  %v1141_v25 = vand.u32 4294901760, %v1140_v19  ;;  %v2822_v15 = vand.u32 4294901760, %v1274_v44  ;;  %vm1464_vm1 = vcmask 254976  }
 0x1af   :  { %v875_v34 = vadd.f32 %v874_v30, %v872_v17  ;;  %v1147_v29 = vand.u32 4294901760, %v1146_v31  ;;  %v2824_v30 = vand.u32 4294901760, %v1273_v32  ;;  %v1272_v17 = vld [vmem:[%s2921_s1 + $0xc0] sm:$0xff] }
 0x1b0   :  { %948 = vmatpush.msrb.mxu3 %v947_v14  ;;  %983 = vmatpush.msra.mxu2 %v2774_v58 }
 0x1b1   :  { %878 = vrot.lane.b32.xlu0 %v875_v34, %s1848_s24  ;;  %v876_v18 = vmul.f32 %v875_v34, %v2164_v20  ;;  %v2829_v34 = vand.u32 4294901760, %v1272_v17 }
 0x1b2   :  { %986 = vmatpush.msra.mxu2 %v950_v59 }
 0x1b3   :  { %v1082_v53 = vsel %vm893_vm0, %v876_v18, 0 }
 0x1b4   :  { %v2761_v52 = vand.u32 4294901760, %v1082_v53  ;;  %989 = vmatpush.msra.mxu2 %v956_v16 }
 0x1b6   :  { %v1105_v4 = vsub.f32 %v1082_v53, %v2761_v52  ;;  %v2835_v53 = vsub.f32 %v1274_v44, %v2822_v15 }
 0x1b8   :  { %1180 = vmatmul.f32.vlgmr.msra.gmra.mxu0 %v1105_v4  ;;  %v1106_v22 = vand.u32 4294901760, %v1105_v4  ;;  %v2849_v33 = vand.u32 4294901760, %v2835_v53 }
 0x1ba   :  { %1207 = vmatmul.f32.vlgmr.msra.gmra.mxu1 %v1106_v22  ;;  %v2764_v28 = vsub.f32 %v1105_v4, %v1106_v22  ;;  %v2843_v22 = vsub.f32 %v1272_v17, %v2829_v34 }
 0x223   :  { %v879_v26 = vpop.permute.xlu0 %878 }
 0x224   :  { %v881_v55 = vmul.f32 %v879_v26, %v2164_v20  ;;  %v952_v20 = vsub.f32 %v950_v59, %v951_v61 }
 0x226   :  { %891 = vrot.lane.b32.xlu1 %v881_v55, %s1847_s22  ;;  %v953_v6 = vand.u32 4294901760, %v952_v20 }
 0x228   :  { %954 = vmatpush.msrb.mxu3 %v953_v6 }
 0x22a   :  { %960 = vmatpush.msrb.mxu3 %v959_v7 }
 0x22c   :  { %1009 = vmatpush.msra.mxu3 %v908_v21 }
 0x22e   :  { %1011 = vmatpush.msra.mxu3 %v910_v39 }
 0x230   :  { %1013 = vmatpush.msra.mxu3 %v912_v56 }
 0x232   :  { %1015 = vmatpush.msra.mxu3 %v914_v54 }
 0x237   :  { %v1208_v2 = vpop.f32.mrf.mxu1 }
 0x298   :  { %v892_v41 = vpop.permute.xlu1 %891 }
 0x299   :  { %v894_v43 = vsel %vm893_vm0, %v892_v41, 0 }
 0x29a   :  { %v916_v27 = vand.u32 4294901760, %v894_v43 }
 0x29c   :  { %v917_v11 = vsub.f32 %v894_v43, %v916_v27  ;;  %962 = vmatmul.f32.vlgmr.msrb.gmra.mxu3 %v916_v27  ;;  %v1763_v43 = vld [vmem:[%s2921_s1 + $0xe1] ss:$0 sm:$0xff] }
 0x29d   :  { %1069 = vmatpush.msrb.mxu3 %v908_v21 }
 0x29e   :  { %v918_v3 = vand.u32 4294901760, %v917_v11 }
 0x29f   :  { %1071 = vmatpush.msrb.mxu3 %v910_v39  ;;  %v2857_v39 = vand.u32 4294901760, %v2843_v22 }
 0x2a0   :  { %v919_v9 = vsub.f32 %v917_v11, %v918_v3 }
 0x2a1   :  { %1073 = vmatpush.msrb.mxu3 %v912_v56  ;;  %v1341_v14 = vsub.f32 %v2843_v22, %v2857_v39 }
 0x2a2   :  { %v920_v13 = vand.u32 4294901760, %v919_v9 }
 0x2a3   :  { %1075 = vmatpush.msrb.mxu3 %v914_v54  ;;  %v1342_v50 = vand.u32 4294901760, %v1341_v14 }
 0x2a4   :  { %921 = vmatmul.f32.vlgmr.msrb.gmra.mxu2 %v920_v13  ;;  %1019 = vmatmul.f32.vlgmr.msra.gmra.mxu3 %v918_v3 }
 0x2a5   :  { %1038 = vmatpush.msrb.mxu2 %v939_v63  ;;  %1130 = vmatpush.msra.mxu3 %v1129_v37  ;;  %v1329_v63 = vsub.f32 %v2835_v53, %v2849_v33 }
 0x2a7   :  { %1042 = vmatpush.msrb.mxu2 %v945_v0  ;;  %1136 = vmatpush.msra.mxu3 %v1135_v36  ;;  %v1330_v1 = vand.u32 4294901760, %v1329_v63 }
 0x2a9   :  { %1046 = vmatpush.msrb.mxu2 %v951_v61  ;;  %1142 = vmatpush.msra.mxu3 %v1141_v25 }
 0x2ab   :  { %1050 = vmatpush.msrb.mxu2 %v957_v49  ;;  %1148 = vmatpush.msra.mxu3 %v1147_v29  ;;  %v1181_v49 = vpop.f32.mrf.mxu0 }
 0x2ac   :  { %992 = vmatmul.f32.vlgmr.msra.gmra.mxu2 %v917_v11  ;;  %1077 = vmatmul.f32.vlgmr.msrb.gmra.mxu3 %v916_v27 }
 0x2ad   :  { %1097 = vmatpush.msra.mxu2 %v2172_v24  ;;  %1257 = vmatpush.msrb.mxu3 %v2172_v24  ;;  %v1108_v24 = vand.u32 4294901760, %v2764_v28 }
 0x2af   :  { %1099 = vmatpush.msra.mxu2 %v2707_v42  ;;  %1259 = vmatpush.msrb.mxu3 %v2707_v42 }
 0x2b1   :  { %1101 = vmatpush.msra.mxu2 %v2709_v38  ;;  %1261 = vmatpush.msrb.mxu3 %v2709_v38 }
 0x2b3   :  { %1103 = vmatpush.msra.mxu2 %v2727_v40  ;;  %1263 = vmatpush.msrb.mxu3 %v2727_v40  ;;  %v1275_v40 = vld [vmem:[%s2921_s1 + $0xd8] sm:$0xff] }
 0x2b4   :  { %1052 = vmatmul.f32.vlgmr.msrb.gmra.mxu2 %v916_v27  ;;  %1150 = vmatmul.f32.vlgmr.msra.gmra.mxu3 %v2761_v52  ;;  %v2820_v35 = vand.u32 4294901760, %v1275_v40 }
 0x2b5   :  { %1226 = vmatpush.msrb.mxu2 %v1127_v8 }
 0x2b6   :  { %v2832_v18 = vsub.f32 %v1275_v40, %v2820_v35  ;;  %1392 = vmatpush.msra.mxu3 %v2820_v35  ;;  %1292 = vmatpush.msrb.mxu0 %v2820_v35 }
 0x2b7   :  { %1230 = vmatpush.msrb.mxu2 %v1133_v60 }
 0x2b8   :  { %v2846_v28 = vand.u32 4294901760, %v2832_v18  ;;  %1394 = vmatpush.msra.mxu3 %v2822_v15  ;;  %1294 = vmatpush.msrb.mxu0 %v2822_v15 }
 0x2b9   :  { %1234 = vmatpush.msrb.mxu2 %v1139_v12 }
 0x2ba   :  { %v1323_v58 = vsub.f32 %v2832_v18, %v2846_v28  ;;  %1396 = vmatpush.msra.mxu3 %v2824_v30  ;;  %1296 = vmatpush.msrb.mxu0 %v2824_v30 }
 0x2bb   :  { %1238 = vmatpush.msrb.mxu2 %v1145_v57 }
 0x2bc   :  { %1109 = vmatmul.f32.vlgmr.msra.gmra.mxu2 %v1108_v24  ;;  %1265 = vmatmul.f32.vlgmr.msrb.gmra.mxu3 %v2761_v52  ;;  %v1324_v45 = vand.u32 4294901760, %v1323_v58 }
 0x2bd   :  { %1363 = vmatpush.msra.mxu2 %v2832_v18  ;;  %1398 = vmatpush.msra.mxu3 %v2829_v34 }
 0x2be   :  { %1298 = vmatpush.msrb.mxu0 %v2829_v34  ;;  %1325 = vmatpush.msrb.mxu1 %v1324_v45 }
 0x2bf   :  { %1366 = vmatpush.msra.mxu2 %v2835_v53  ;;  %1524 = vmatpush.msrb.mxu3 %v1324_v45 }
 0x2c0   :  { %1421 = vmatpush.msra.mxu0 %v2846_v28  ;;  %1331 = vmatpush.msrb.mxu1 %v1330_v1 }
 0x2c1   :  { %1530 = vmatpush.msrb.mxu3 %v1330_v1 }
 0x2c2   :  { %1425 = vmatpush.msra.mxu0 %v2849_v33 }
 0x2c4   :  { %1240 = vmatmul.f32.vlgmr.msrb.gmra.mxu2 %v2761_v52  ;;  %v2838_v52 = vsub.f32 %v1273_v32, %v2824_v30 }
 0x2c6   :  { %v2853_v62 = vand.u32 4294901760, %v2838_v52  ;;  %1369 = vmatpush.msra.mxu2 %v2838_v52 }
 0x2c8   :  { %v1335_v0 = vsub.f32 %v2838_v52, %v2853_v62  ;;  %1372 = vmatpush.msra.mxu2 %v2843_v22  ;;  %1429 = vmatpush.msra.mxu0 %v2853_v62 }
 0x2ca   :  { %v1336_v55 = vand.u32 4294901760, %v1335_v0  ;;  %1491 = vmatpush.msrb.mxu2 %v2820_v35  ;;  %1433 = vmatpush.msra.mxu0 %v2857_v39 }
 0x2cc   :  { %1337 = vmatpush.msrb.mxu1 %v1336_v55  ;;  %1493 = vmatpush.msrb.mxu2 %v2822_v15 }
 0x2cd   :  { %1536 = vmatpush.msrb.mxu3 %v1336_v55 }
 0x2ce   :  { %1343 = vmatpush.msrb.mxu1 %v1342_v50  ;;  %1495 = vmatpush.msrb.mxu2 %v2824_v30 }
 0x2cf   :  { %1542 = vmatpush.msrb.mxu3 %v1342_v50 }
 0x2d0   :  { %1452 = vmatpush.msra.mxu1 %v2820_v35  ;;  %1497 = vmatpush.msrb.mxu2 %v2829_v34 }
 0x2d2   :  { %1454 = vmatpush.msra.mxu1 %v2822_v15 }
 0x2d4   :  { %1456 = vmatpush.msra.mxu1 %v2824_v30 }
 0x2d6   :  { %1458 = vmatpush.msra.mxu1 %v2829_v34 }
 0x31f   :  { %v963_v42 = vpop.f32.mrf.mxu3 }
 0x327   :  { %v922_v38 = vpop.f32.mrf.mxu2  ;;  %v1020_v51 = vpop.f32.mrf.mxu3 }
 0x328   :  { %v964_v4 = vadd.f32 %v963_v42, %v922_v38 }
 0x32f   :  { %v993_v10 = vpop.f32.mrf.mxu2  ;;  %v1078_v46 = vpop.f32.mrf.mxu3 }
 0x330   :  { %v994_v21 = vadd.f32 %v993_v10, %v964_v4 }
 0x332   :  { %v1021_v26 = vadd.f32 %v1020_v51, %v994_v21 }
 0x337   :  { %v1053_v48 = vpop.f32.mrf.mxu2  ;;  %v1151_v54 = vpop.f32.mrf.mxu3 }
 0x338   :  { %v1054_v47 = vadd.f32 %v1053_v48, %v1021_v26 }
 0x33a   :  { %v1079_v56 = vadd.f32 %v1078_v46, %v1054_v47 }
 0x33f   :  { %v1110_v59 = vpop.f32.mrf.mxu2  ;;  %v1266_v8 = vpop.f32.mrf.mxu3 }
 0x340   :  { %v1111_v16 = vadd.f32 %v1110_v59, %v1079_v56 }
 0x342   :  { %v1152_v61 = vadd.f32 %v1151_v54, %v1111_v16 }
 0x344   :  { %v1182_v20 = vadd.f32 %v1181_v49, %v1152_v61 }
 0x346   :  { %v1209_v6 = vadd.f32 %v1208_v2, %v1182_v20 }
 0x347   :  { %v1241_v7 = vpop.f32.mrf.mxu2 }
 0x348   :  { %v1242_v41 = vadd.f32 %v1241_v7, %v1209_v6  ;;  %v1764_v6 = vld [vmem:[%s2921_s1 + $0xe2] ss:$0 sm:$0xff] }
 0x34a   :  { %v1267_v27 = vadd.f32 %v1266_v8, %v1242_v41  ;;  %v1765_v8 = vld [vmem:[%s2921_s1 + $0xe3] ss:$0 sm:$0xff] }
 0x34c   :  { %v1271_v60 = vadd.f32 %v1763_v43, %v1267_v27 }
 0x34e   :  { %v1277_v11 = vsel %vm893_vm0, %v1271_v60, 0 }
 0x34f   :  { %v1299_v23 = vand.u32 4294901760, %v1277_v11 }
 0x351   :  { %1345 = vmatmul.f32.vlgmr.msrb.gmra.mxu1 %v1299_v23  ;;  %v1300_v12 = vsub.f32 %v1277_v11, %v1299_v23 }
 0x352   :  { %1591 = vmatpush.msrb.mxu1 %v2820_v35 }
 0x353   :  { %1375 = vmatmul.f32.vlgmr.msra.gmra.mxu2 %v1300_v12  ;;  %v1301_v3 = vand.u32 4294901760, %v1300_v12 }
 0x354   :  { %1593 = vmatpush.msrb.mxu1 %v2822_v15  ;;  %1620 = vmatpush.msra.mxu2 %v2846_v28 }
 0x355   :  { %1402 = vmatmul.f32.vlgmr.msra.gmra.mxu3 %v1301_v3  ;;  %v1302_v5 = vsub.f32 %v1300_v12, %v1301_v3 }
 0x356   :  { %1595 = vmatpush.msrb.mxu1 %v2824_v30  ;;  %1651 = vmatpush.msra.mxu3 %v2820_v35 }
 0x357   :  { %v1303_v57 = vand.u32 4294901760, %v1302_v5  ;;  %1624 = vmatpush.msra.mxu2 %v2849_v33 }
 0x358   :  { %1597 = vmatpush.msrb.mxu1 %v2829_v34  ;;  %1653 = vmatpush.msra.mxu3 %v2822_v15 }
 0x359   :  { %1304 = vmatmul.f32.vlgmr.msrb.gmra.mxu0 %v1303_v57  ;;  %1460 = vmatmul.f32.vlgmr.msra.gmra.mxu1 %v1299_v23 }
 0x35a   :  { %1562 = vmatpush.msrb.mxu0 %v2832_v18  ;;  %1655 = vmatpush.msra.mxu3 %v2824_v30 }
 0x35b   :  { %1628 = vmatpush.msra.mxu2 %v2853_v62 }
 0x35c   :  { %1565 = vmatpush.msrb.mxu0 %v2835_v53  ;;  %1657 = vmatpush.msra.mxu3 %v2829_v34 }
 0x35d   :  { %1632 = vmatpush.msra.mxu2 %v2857_v39 }
 0x35e   :  { %1568 = vmatpush.msrb.mxu0 %v2838_v52 }
 0x360   :  { %1571 = vmatpush.msrb.mxu0 %v2843_v22 }
 0x361   :  { %1435 = vmatmul.f32.vlgmr.msra.gmra.mxu0 %v1299_v23 }
 0x3ce   :  { %v1346_v9 = vpop.f32.mrf.mxu1 }
 0x3d6   :  { %v1305_v37 = vpop.f32.mrf.mxu0  ;;  %v1376_v13 = vpop.f32.mrf.mxu2 }
 0x3d7   :  { %v1347_v19 = vadd.f32 %v1346_v9, %v1305_v37  ;;  %v1461_v42 = vpop.f32.mrf.mxu1 }
 0x3d8   :  { %v1403_v31 = vpop.f32.mrf.mxu3 }
 0x3d9   :  { %v1377_v36 = vadd.f32 %v1376_v13, %v1347_v19 }
 0x3db   :  { %v1404_v25 = vadd.f32 %v1403_v31, %v1377_v36 }
 0x3de   :  { %v1436_v29 = vpop.f32.mrf.mxu0 }
 0x3df   :  { %v1437_v24 = vadd.f32 %v1436_v29, %v1404_v25 }
 0x3e1   :  { %v1462_v38 = vadd.f32 %v1461_v42, %v1437_v24 }
 0x3e3   :  { %v1465_v51 = vsel %vm1464_vm1, %v1462_v38, 0.0 }
 0x3e4   :  { %v1466_v40 = vrot.slane %v1465_v51, 4 }
 0x3e6   :  { %v1467_v44 = vadd.f32 %v1466_v40, %v1465_v51 }
 0x3e8   :  { %v1468_v32 = vrot.slane %v1467_v44, 2 }
 0x3ea   :  { %v1469_v10 = vadd.f32 %v1468_v32, %v1467_v44 }
 0x3ec   :  { %v1470_v35 = vrot.slane %v1469_v10, 1 }
 0x3ee   :  { %v1471_v15 = vadd.f32 %v1470_v35, %v1469_v10 }
 0x3f0   :  { %v1472_v30 = vmul.f32 0.5, %v1471_v15 }
 0x3f2   :  { %v1473_v17 = vsub.f32 %v1271_v60, %v1472_v30 }
 0x3f4   :  { %v1474_v34 = vmul.f32 %v1473_v17, %v1473_v17  ;;  %v1674_v43 = vmul.f32 %v1764_v6, %v1473_v17 }
 0x3f6   :  { %v1476_v18 = vsel %vm893_vm0, %v1474_v34, 0 }
 0x3f7   :  { %v1498_v53 = vand.u32 4294901760, %v1476_v18 }
 0x3f9   :  { %1544 = vmatmul.f32.vlgmr.msrb.gmra.mxu3 %v1498_v53  ;;  %v1499_v52 = vsub.f32 %v1476_v18, %v1498_v53 }
 0x3fb   :  { %1574 = vmatmul.f32.vlgmr.msrb.gmra.mxu0 %v1499_v52  ;;  %v1500_v4 = vand.u32 4294901760, %v1499_v52 }
 0x3fd   :  { %1601 = vmatmul.f32.vlgmr.msrb.gmra.mxu1 %v1500_v4  ;;  %v1501_v22 = vsub.f32 %v1499_v52, %v1500_v4 }
 0x3ff   :  { %v1502_v28 = vand.u32 4294901760, %v1501_v22 }
 0x401   :  { %1503 = vmatmul.f32.vlgmr.msrb.gmra.mxu2 %v1502_v28  ;;  %1659 = vmatmul.f32.vlgmr.msra.gmra.mxu3 %v1498_v53 }
 0x409   :  { %1634 = vmatmul.f32.vlgmr.msra.gmra.mxu2 %v1498_v53 }
 0x478   :  { %v1575_v39 = vpop.f32.mrf.mxu0 }
 0x47a   :  { %v1602_v58 = vpop.f32.mrf.mxu1 }
 0x47c   :  { %v1545_v33 = vpop.f32.mrf.mxu3 }
 0x484   :  { %v1504_v62 = vpop.f32.mrf.mxu2  ;;  %v1660_v45 = vpop.f32.mrf.mxu3 }
 0x485   :  { %v1546_v21 = vadd.f32 %v1545_v33, %v1504_v62 }
 0x487   :  { %v1576_v46 = vadd.f32 %v1575_v39, %v1546_v21 }
 0x489   :  { %v1603_v63 = vadd.f32 %v1602_v58, %v1576_v46 }
 0x48c   :  { %v1635_v0 = vpop.f32.mrf.mxu2 }
 0x48d   :  { %v1636_v48 = vadd.f32 %v1635_v0, %v1603_v63 }
 0x48f   :  { %v1661_v1 = vadd.f32 %v1660_v45, %v1636_v48 }
 0x491   :  { %v1663_v14 = vsel %vm1464_vm1, %v1661_v1, 0.0 }
 0x492   :  { %v1664_v26 = vrot.slane %v1663_v14, 4 }
 0x494   :  { %v1665_v55 = vadd.f32 %v1664_v26, %v1663_v14 }
 0x496   :  { %v1666_v47 = vrot.slane %v1665_v55, 2 }
 0x498   :  { %v1667_v50 = vadd.f32 %v1666_v47, %v1665_v55 }
 0x49a   :  { %v1668_v56 = vrot.slane %v1667_v50, 1 }
 0x49c   :  { %v1669_v54 = vadd.f32 %v1668_v56, %v1667_v50 }
 0x49e   :  { %v1670_v59 = vmul.f32 0.5, %v1669_v54 }
 0x4a0   :  { %v1675_v16 = vadd.f32 1e-05, %v1670_v59 }
 0x4a2   :  { %1830 = vrsqrt.f32 %v1675_v16  ;;  %vm1682_vm3 = vweird.f32 %v1675_v16 }
 0x4a8   :  { %v1831_v61 = vpop.eup %1830 }
 0x4a9   :  { %v1677_v49 = vmul.f32 %v1831_v61, %v1675_v16  ;;  %vm1683_vm2 = vweird.f32 %v1831_v61 }
 0x4aa   :  { %vm1684_vm4 = vmor %vm1682_vm3, %vm1683_vm2 }
 0x4ab   :  { %v1678_v20 = vmul.f32 %v1831_v61, %v1677_v49 }
 0x4ad   :  { %v1679_v2 = vmul.f32 0.5, %v1678_v20 }
 0x4af   :  { %v1680_v7 = vsub.f32 1.5, %v1679_v2 }
 0x4b1   :  { %v1681_v41 = vmul.f32 %v1831_v61, %v1680_v7 }
 0x4b3   :  { %v1685_v27 = vsel %vm1684_vm4, %v1831_v61, %v1681_v41 }
 0x4b4   :  { %v1686_v60 = vmul.f32 %v1685_v27, %v1674_v43 }
 0x4b6   :  { %v1688_v11 = vadd.f32 %v1765_v8, %v1686_v60 }
 0x4b8   :  { %1689 = vst.msk [vmem:[%s2923_s3] sm:$0x3] %vm1464_vm1, %v1688_v11 }
 0x4b9   :  { %1694 = vsyncpa [#allocation3], 1 }

</bundles_post_ra>
